<compile_context>
chip_gen: v7x
topology: tpu7x:2x2x1
jax: 0.10.0
libtpu: 0.0.40
codegen_flags: <defaults>
</compile_context>

<pallas_src>
import jax
import jax.numpy as jnp
from jax.experimental import pallas as pl
from jax.experimental.pallas import tpu as pltpu

_LANE = 128


def multihead_bnn_kernel(
    x_ref,
    w0_ref, b0_ref,
    w1_ref, b1_ref,
    w2_ref, b2_ref,
    w3_ref, b3_ref,
    hw1_ref, hb1_ref,      # heads' first layer, concatenated along the out dim
    hw2_ref, hb2_ref,      # heads' second layer, assembled block-diagonal
    out_ref,
):
    cdt = w0_ref.dtype  # compute dtype of the matmul inputs (bf16 or f32)

    def layer(a, w_ref, b_ref):
        # MXU matmul with f32 accumulation, bias add + ReLU on the VPU.
        y = jnp.dot(a, w_ref[...], preferred_element_type=jnp.float32) + b_ref[...]
        return jnp.maximum(y, 0.0).astype(cdt)

    # ----- trunk (model1): 4 x (Linear -> ReLU) -----
    h = layer(x_ref[...], w0_ref, b0_ref)
    h = layer(h, w1_ref, b1_ref)
    h = layer(h, w2_ref, b2_ref)
    x1 = layer(h, w3_ref, b3_ref)

    # ----- heads (model2), batched: one wide + one block-diagonal matmul -----
    hh = layer(x1, hw1_ref, hb1_ref)
    out = jnp.dot(hh, hw2_ref[...], preferred_element_type=jnp.float32) + hb2_ref[...]
    out_ref[...] = out.astype(out_ref.dtype)   # lane-padded -> full-width stores


def _round_up(v, m):
    return ((v + m - 1) // m) * m


def multihead_bnn_forward(x, params, n_output, *, block_b=512,
                          compute_dtype=jnp.bfloat16):
    B, n_feature = x.shape
    h2 = params["hw1"].shape[1]   # n_hidden // 2
    h4 = params["hw1"].shape[2]   # n_hidden // 4

    # ---- one-time wrapper-side head batching (cheap, outside the kernel) ----
    # hw1: (n_output, h2, h4) -> (h2, n_output*h4); columns ordered head-major.
    hw1_cat = jnp.transpose(params["hw1"], (1, 0, 2)).reshape(h2, n_output * h4)
    hb1_cat = params["hb1"].reshape(1, n_output * h4)
    # hw2: (n_output, h4, 2) -> block-diagonal (n_output*h4, n_output*2) with
    # exact zeros off-diagonal so heads cannot cross-contaminate.
    eye = jnp.eye(n_output, dtype=params["hw2"].dtype)
    hw2_bd = (eye[:, None, :, None] * params["hw2"][:, :, None, :]).reshape(
        n_output * h4, n_output * 2)
    hb2_cat = params["hb2"].reshape(1, n_output * 2)
    # TODO(synk): for n_output >~ 32 the block-diagonal hw2_bd costs
    # O(n_output^2 * h4) VMEM/FLOPs; replace with a per-head VPU multiply +
    # segmented lane reduction (or head-tile the last matmul) at that scale.

    # ---- lane-pad hidden / output widths to multiples of 128 ----------------
    d0 = n_feature                                  # streamed input dim: unpadded
    d1 = _round_up(params["w0"].shape[1], _LANE)    # n_hidden
    d2 = _round_up(params["w1"].shape[1], _LANE)    # 2 * n_hidden
    d3 = _round_up(params["w2"].shape[1], _LANE)    # n_hidden
    d4 = _round_up(params["w3"].shape[1], _LANE)    # n_hidden // 2
    d5 = _round_up(n_output * h4, _LANE)            # all heads, hidden
    d6 = _round_up(n_output * 2, _LANE)             # all heads, output

    def pad2d(a, rows, cols):
        return jnp.pad(a, ((0, rows - a.shape[0]), (0, cols - a.shape[1])))

    def w(a, rows, cols):                  # matmul inputs -> compute dtype
        return pad2d(a, rows, cols).astype(compute_dtype)

    def bias(a, cols):                     # biases stay f32
        return pad2d(a, 1, cols).astype(jnp.float32)

    weights = (
        w(params["w0"], d0, d1), bias(params["b0"], d1),
        w(params["w1"], d1, d2), bias(params["b1"], d2),
        w(params["w2"], d2, d3), bias(params["b2"], d3),
        w(params["w3"], d3, d4), bias(params["b3"], d4),
        w(hw1_cat, d4, d5),      bias(hb1_cat, d5),
        w(hw2_bd, d5, d6),       bias(hb2_cat, d6),
    )
    x_c = x.astype(compute_dtype)

    # ---- batch tile: multiple of 16 (bf16 sublanes), 128-aligned when large,
    # >= 2 grid steps when B allows (megacore), bounded by a v7x-safe budget ---
    tb = _round_up(-(-B // 2), 16)          # ceil(B/2) -> grid >= 2 when B > 16
    if tb > 128:
        tb = _round_up(tb, 128)
    tb = min(tb, max(16, (block_b // 16) * 16))

    itemsize_c = jnp.dtype(compute_dtype).itemsize
    weight_bytes = sum(int(a.size) * a.dtype.itemsize for a in weights)
    widest = max(d1, d2, d3, d4, d5, d6)

    def vmem_need(tb_):
        x_buf = 2 * tb_ * d0 * itemsize_c     # double-buffered input tile
        out_buf = 2 * tb_ * d6 * 4            # double-buffered f32 output tile
        act = 4 * tb_ * widest * 4            # in-flight activations (generous)
        return weight_bytes + x_buf + out_buf + act

    VMEM_BUDGET = 48 << 20                    # conservative vs v7x's 64 MiB VMEM
    while tb > 16 and vmem_need(tb) > VMEM_BUDGET:
        tb = max(16, ((tb // 2) // 16) * 16)
    vmem_limit = int(min(max(2 * vmem_need(tb), 16 << 20), 64 << 20))

    # Pad B to a tile multiple: no OOB reads on the last tile; padded rows are
    # zeros and get sliced off below.
    B_pad = _round_up(B, tb)
    if B_pad != B:
        x_c = jnp.pad(x_c, ((0, B_pad - B), (0, 0)))
    grid = (B_pad // tb,)

    mm_dims = ((d0, d1), (d1, d2), (d2, d3), (d3, d4), (d4, d5), (d5, d6))
    cost = pl.CostEstimate(
        flops=2 * B_pad * sum(k * n for k, n in mm_dims),
        transcendentals=0,
        bytes_accessed=B_pad * d0 * itemsize_c + weight_bytes + B_pad * d6 * 4,
    )

    x_spec = pl.BlockSpec((tb, d0), lambda i: (i, 0))
    out_spec = pl.BlockSpec((tb, d6), lambda i: (i, 0))

    def run(single_buffer_weights):
        if single_buffer_weights:
            # Constant index_map -> block never changes; a single buffer halves
            # the resident-weight VMEM vs the default double buffer.
            wspec = lambda a: pl.BlockSpec(a.shape, lambda i: (0, 0),
                                           pipeline_mode=pl.Buffered(1))
        else:
            wspec = lambda a: pl.BlockSpec(a.shape, lambda i: (0, 0))
        return pl.pallas_call(
            multihead_bnn_kernel,
            out_shape=jax.ShapeDtypeStruct((B_pad, d6), jnp.float32),
            grid=grid,
            in_specs=[x_spec] + [wspec(a) for a in weights],
            out_specs=out_spec,
            compiler_params=pltpu.CompilerParams(
                dimension_semantics=("parallel",),
                vmem_limit_bytes=vmem_limit,
            ),
            cost_estimate=cost,
        )(x_c, *weights)

    try:
        flat = run(single_buffer_weights=True)
    except Exception:
        # Fallback if this JAX build rejects pipeline_mode on pallas_call specs.
        flat = run(single_buffer_weights=False)

    return flat[:B, : n_output * 2].reshape(B, n_output, 2)


def _linear_init(key, fan_in, fan_out):
    """PyTorch nn.Linear default init, stored as (in, out) for x @ W + b."""
    kw, kb = jax.random.split(key)
    bound = 1.0 / jnp.sqrt(float(fan_in))
    wgt = jax.random.uniform(kw, (fan_in, fan_out), jnp.float32, -bound, bound)
    bia = jax.random.uniform(kb, (1, fan_out), jnp.float32, -bound, bound)
    return wgt, bia


def init_params(key, n_feature, n_hidden, n_output):
    h, h2x, h2, h4 = n_hidden, n_hidden * 2, n_hidden // 2, n_hidden // 4
    keys = jax.random.split(key, 4 + 2 * n_output)

    w0, b0 = _linear_init(keys[0], n_feature, h)
    w1, b1 = _linear_init(keys[1], h, h2x)
    w2, b2 = _linear_init(keys[2], h2x, h)
    w3, b3 = _linear_init(keys[3], h, h2)

    hw1, hb1, hw2, hb2 = [], [], [], []
    for i in range(n_output):
        w_a, b_a = _linear_init(keys[4 + 2 * i], h2, h4)
        w_b, b_b = _linear_init(keys[5 + 2 * i], h4, 2)
        hw1.append(w_a)
        hb1.append(b_a)
        hw2.append(w_b)
        hb2.append(b_b)

    return dict(
        w0=w0, b0=b0, w1=w1, b1=b1, w2=w2, b2=b2, w3=w3, b3=b3,
        hw1=jnp.stack(hw1),  # (n_output, h2, h4)
        hb1=jnp.stack(hb1),  # (n_output, 1, h4)
        hw2=jnp.stack(hw2),  # (n_output, h4, 2)
        hb2=jnp.stack(hb2),  # (n_output, 1, 2)
    )


def reference_forward(x, params, n_output):
    """Pure-JAX f32 reference mirroring the PyTorch forward."""
    h = jnp.maximum(x @ params["w0"] + params["b0"], 0.0)
    h = jnp.maximum(h @ params["w1"] + params["b1"], 0.0)
    h = jnp.maximum(h @ params["w2"] + params["b2"], 0.0)
    x1 = jnp.maximum(h @ params["w3"] + params["b3"], 0.0)
    outs = []
    for i in range(n_output):
        hh = jnp.maximum(x1 @ params["hw1"][i] + params["hb1"][i], 0.0)
        outs.append((hh @ params["hw2"][i] + params["hb2"][i])[:, None, :])
    return jnp.concatenate(outs, axis=1)


if __name__ == "__main__":
    # Small shapes consistent with the module: n_hidden must be divisible by 4.
    B, n_feature, n_hidden, n_output = 8, 16, 32, 4

    key = jax.random.PRNGKey(0)
    kx, kp = jax.random.split(key)
    x = jax.random.normal(kx, (B, n_feature), jnp.float32)
    params = init_params(kp, n_feature, n_hidden, n_output)

    out = jax.block_until_ready(multihead_bnn_forward(x, params, n_output))
    ref = reference_forward(x, params, n_output)
    assert out.shape == (B, n_output, 2), out.shape
    # bf16 matmul inputs with f32 accumulation -> loosened tolerance vs f32 ref.
    assert jnp.allclose(out, ref, atol=5e-2, rtol=5e-2), "bf16 mismatch vs reference"

    # Also verify the pure-f32 kernel path matches tightly.
    out_f32 = jax.block_until_ready(
        multihead_bnn_forward(x, params, n_output, compute_dtype=jnp.float32))
    assert jnp.allclose(out_f32, ref, atol=1e-5, rtol=1e-5), "f32 mismatch vs reference"

    print("KERNEL_OK")
</pallas_src>

<mosaic_0001>
module attributes {stable_mosaic.version = 11 : i64} {
  func.func @multihead_bnn_kernel(%arg0: i32, %arg1: memref<16x16xbf16, #tpu.memory_space<vmem>>, %arg2: memref<16x128xbf16, #tpu.memory_space<vmem>>, %arg3: memref<1x128xf32, #tpu.memory_space<vmem>>, %arg4: memref<128x128xbf16, #tpu.memory_space<vmem>>, %arg5: memref<1x128xf32, #tpu.memory_space<vmem>>, %arg6: memref<128x128xbf16, #tpu.memory_space<vmem>>, %arg7: memref<1x128xf32, #tpu.memory_space<vmem>>, %arg8: memref<128x128xbf16, #tpu.memory_space<vmem>>, %arg9: memref<1x128xf32, #tpu.memory_space<vmem>>, %arg10: memref<128x128xbf16, #tpu.memory_space<vmem>>, %arg11: memref<1x128xf32, #tpu.memory_space<vmem>>, %arg12: memref<128x128xbf16, #tpu.memory_space<vmem>>, %arg13: memref<1x128xf32, #tpu.memory_space<vmem>>, %arg14: memref<16x128xf32, #tpu.memory_space<vmem>>) attributes {dimension_semantics = [#tpu.dimension_semantics<parallel>], iteration_bounds = array<i64: 1>, scalar_prefetch = 0 : i64, scratch_operands = 0 : i64, tpu.core_type = #tpu.core_type<tc>, window_params = [{transform_indices = @transform_0, window_bounds = array<i64: 16, 16>}, {pipeline_mode = #tpu.pipeline_mode<synchronous>, transform_indices = @transform_1, window_bounds = array<i64: 16, 128>}, {pipeline_mode = #tpu.pipeline_mode<synchronous>, transform_indices = @transform_2, window_bounds = array<i64: 1, 128>}, {pipeline_mode = #tpu.pipeline_mode<synchronous>, transform_indices = @transform_3, window_bounds = array<i64: 128, 128>}, {pipeline_mode = #tpu.pipeline_mode<synchronous>, transform_indices = @transform_4, window_bounds = array<i64: 1, 128>}, {pipeline_mode = #tpu.pipeline_mode<synchronous>, transform_indices = @transform_5, window_bounds = array<i64: 128, 128>}, {pipeline_mode = #tpu.pipeline_mode<synchronous>, transform_indices = @transform_6, window_bounds = array<i64: 1, 128>}, {pipeline_mode = #tpu.pipeline_mode<synchronous>, transform_indices = @transform_7, window_bounds = array<i64: 128, 128>}, {pipeline_mode = #tpu.pipeline_mode<synchronous>, transform_indices = @transform_8, window_bounds = array<i64: 1, 128>}, {pipeline_mode = #tpu.pipeline_mode<synchronous>, transform_indices = @transform_9, window_bounds = array<i64: 128, 128>}, {pipeline_mode = #tpu.pipeline_mode<synchronous>, transform_indices = @transform_10, window_bounds = array<i64: 1, 128>}, {pipeline_mode = #tpu.pipeline_mode<synchronous>, transform_indices = @transform_11, window_bounds = array<i64: 128, 128>}, {pipeline_mode = #tpu.pipeline_mode<synchronous>, transform_indices = @transform_12, window_bounds = array<i64: 1, 128>}, {transform_indices = @transform_13, window_bounds = array<i64: 16, 128>}]} {
    %c0 = arith.constant 0 : index
    %c0_0 = arith.constant 0 : index
    %0 = vector.load %arg1[%c0, %c0_0] : memref<16x16xbf16, #tpu.memory_space<vmem>>, vector<16x16xbf16>
    %c0_1 = arith.constant 0 : index
    %c0_2 = arith.constant 0 : index
    %1 = vector.load %arg2[%c0_1, %c0_2] : memref<16x128xbf16, #tpu.memory_space<vmem>>, vector<16x128xbf16>
    %cst = arith.constant dense<0.000000e+00> : vector<16x128xf32>
    %2 = tpu.matmul %0, %1, %cst {dimension_numbers = #tpu.dot_dimension_numbers<[1], [0], [0], [1], [0, 0, 1, 1], [], []>} : vector<16x16xbf16>, vector<16x128xbf16>, vector<16x128xf32> -> vector<16x128xf32>
    %c0_3 = arith.constant 0 : index
    %c0_4 = arith.constant 0 : index
    %3 = vector.load %arg3[%c0_3, %c0_4] : memref<1x128xf32, #tpu.memory_space<vmem>>, vector<1x128xf32>
    %4 = vector.broadcast %3 : vector<1x128xf32> to vector<16x128xf32>
    %5 = arith.addf %2, %4 : vector<16x128xf32>
    %cst_5 = arith.constant 0.000000e+00 : f32
    %6 = vector.broadcast %cst_5 : f32 to vector<16x128xf32>
    %7 = arith.maximumf %5, %6 : vector<16x128xf32>
    %8 = arith.truncf %7 : vector<16x128xf32> to vector<16x128xbf16>
    %c0_6 = arith.constant 0 : index
    %c0_7 = arith.constant 0 : index
    %9 = vector.load %arg4[%c0_6, %c0_7] : memref<128x128xbf16, #tpu.memory_space<vmem>>, vector<128x128xbf16>
    %cst_8 = arith.constant dense<0.000000e+00> : vector<16x128xf32>
    %10 = tpu.matmul %8, %9, %cst_8 {dimension_numbers = #tpu.dot_dimension_numbers<[1], [0], [0], [1], [0, 0, 1, 1], [], []>} : vector<16x128xbf16>, vector<128x128xbf16>, vector<16x128xf32> -> vector<16x128xf32>
    %c0_9 = arith.constant 0 : index
    %c0_10 = arith.constant 0 : index
    %11 = vector.load %arg5[%c0_9, %c0_10] : memref<1x128xf32, #tpu.memory_space<vmem>>, vector<1x128xf32>
    %12 = vector.broadcast %11 : vector<1x128xf32> to vector<16x128xf32>
    %13 = arith.addf %10, %12 : vector<16x128xf32>
    %cst_11 = arith.constant 0.000000e+00 : f32
    %14 = vector.broadcast %cst_11 : f32 to vector<16x128xf32>
    %15 = arith.maximumf %13, %14 : vector<16x128xf32>
    %16 = arith.truncf %15 : vector<16x128xf32> to vector<16x128xbf16>
    %c0_12 = arith.constant 0 : index
    %c0_13 = arith.constant 0 : index
    %17 = vector.load %arg6[%c0_12, %c0_13] : memref<128x128xbf16, #tpu.memory_space<vmem>>, vector<128x128xbf16>
    %cst_14 = arith.constant dense<0.000000e+00> : vector<16x128xf32>
    %18 = tpu.matmul %16, %17, %cst_14 {dimension_numbers = #tpu.dot_dimension_numbers<[1], [0], [0], [1], [0, 0, 1, 1], [], []>} : vector<16x128xbf16>, vector<128x128xbf16>, vector<16x128xf32> -> vector<16x128xf32>
    %c0_15 = arith.constant 0 : index
    %c0_16 = arith.constant 0 : index
    %19 = vector.load %arg7[%c0_15, %c0_16] : memref<1x128xf32, #tpu.memory_space<vmem>>, vector<1x128xf32>
    %20 = vector.broadcast %19 : vector<1x128xf32> to vector<16x128xf32>
    %21 = arith.addf %18, %20 : vector<16x128xf32>
    %cst_17 = arith.constant 0.000000e+00 : f32
    %22 = vector.broadcast %cst_17 : f32 to vector<16x128xf32>
    %23 = arith.maximumf %21, %22 : vector<16x128xf32>
    %24 = arith.truncf %23 : vector<16x128xf32> to vector<16x128xbf16>
    %c0_18 = arith.constant 0 : index
    %c0_19 = arith.constant 0 : index
    %25 = vector.load %arg8[%c0_18, %c0_19] : memref<128x128xbf16, #tpu.memory_space<vmem>>, vector<128x128xbf16>
    %cst_20 = arith.constant dense<0.000000e+00> : vector<16x128xf32>
    %26 = tpu.matmul %24, %25, %cst_20 {dimension_numbers = #tpu.dot_dimension_numbers<[1], [0], [0], [1], [0, 0, 1, 1], [], []>} : vector<16x128xbf16>, vector<128x128xbf16>, vector<16x128xf32> -> vector<16x128xf32>
    %c0_21 = arith.constant 0 : index
    %c0_22 = arith.constant 0 : index
    %27 = vector.load %arg9[%c0_21, %c0_22] : memref<1x128xf32, #tpu.memory_space<vmem>>, vector<1x128xf32>
    %28 = vector.broadcast %27 : vector<1x128xf32> to vector<16x128xf32>
    %29 = arith.addf %26, %28 : vector<16x128xf32>
    %cst_23 = arith.constant 0.000000e+00 : f32
    %30 = vector.broadcast %cst_23 : f32 to vector<16x128xf32>
    %31 = arith.maximumf %29, %30 : vector<16x128xf32>
    %32 = arith.truncf %31 : vector<16x128xf32> to vector<16x128xbf16>
    %c0_24 = arith.constant 0 : index
    %c0_25 = arith.constant 0 : index
    %33 = vector.load %arg10[%c0_24, %c0_25] : memref<128x128xbf16, #tpu.memory_space<vmem>>, vector<128x128xbf16>
    %cst_26 = arith.constant dense<0.000000e+00> : vector<16x128xf32>
    %34 = tpu.matmul %32, %33, %cst_26 {dimension_numbers = #tpu.dot_dimension_numbers<[1], [0], [0], [1], [0, 0, 1, 1], [], []>} : vector<16x128xbf16>, vector<128x128xbf16>, vector<16x128xf32> -> vector<16x128xf32>
    %c0_27 = arith.constant 0 : index
    %c0_28 = arith.constant 0 : index
    %35 = vector.load %arg11[%c0_27, %c0_28] : memref<1x128xf32, #tpu.memory_space<vmem>>, vector<1x128xf32>
    %36 = vector.broadcast %35 : vector<1x128xf32> to vector<16x128xf32>
    %37 = arith.addf %34, %36 : vector<16x128xf32>
    %cst_29 = arith.constant 0.000000e+00 : f32
    %38 = vector.broadcast %cst_29 : f32 to vector<16x128xf32>
    %39 = arith.maximumf %37, %38 : vector<16x128xf32>
    %40 = arith.truncf %39 : vector<16x128xf32> to vector<16x128xbf16>
    %c0_30 = arith.constant 0 : index
    %c0_31 = arith.constant 0 : index
    %41 = vector.load %arg12[%c0_30, %c0_31] : memref<128x128xbf16, #tpu.memory_space<vmem>>, vector<128x128xbf16>
    %cst_32 = arith.constant dense<0.000000e+00> : vector<16x128xf32>
    %42 = tpu.matmul %40, %41, %cst_32 {dimension_numbers = #tpu.dot_dimension_numbers<[1], [0], [0], [1], [0, 0, 1, 1], [], []>} : vector<16x128xbf16>, vector<128x128xbf16>, vector<16x128xf32> -> vector<16x128xf32>
    %c0_33 = arith.constant 0 : index
    %c0_34 = arith.constant 0 : index
    %43 = vector.load %arg13[%c0_33, %c0_34] : memref<1x128xf32, #tpu.memory_space<vmem>>, vector<1x128xf32>
    %44 = vector.broadcast %43 : vector<1x128xf32> to vector<16x128xf32>
    %45 = arith.addf %42, %44 : vector<16x128xf32>
    %c0_35 = arith.constant 0 : index
    %c0_36 = arith.constant 0 : index
    %46 = vector.load %arg14[%c0_35, %c0_36] : memref<16x128xf32, #tpu.memory_space<vmem>>, vector<16x128xf32>
    tpu.vector_store %arg14[%c0_35, %c0_36], %45 {strides = array<i32>} : memref<16x128xf32, #tpu.memory_space<vmem>>, vector<16x128xf32>,
    return
  }
  func.func @transform_0(%arg0: i32) -> (i32, i32) {
    %c0_i32 = arith.constant 0 : i32
    %c0_i32_0 = arith.constant 0 : i32
    return %arg0, %c0_i32 : i32, i32
  }
  func.func @transform_1(%arg0: i32) -> (i32, i32) {
    %c0_i32 = arith.constant 0 : i32
    %c0_i32_0 = arith.constant 0 : i32
    %c0_i32_1 = arith.constant 0 : i32
    return %c0_i32, %c0_i32_0 : i32, i32
  }
  func.func @transform_2(%arg0: i32) -> (i32, i32) {
    %c0_i32 = arith.constant 0 : i32
    %c0_i32_0 = arith.constant 0 : i32
    %c0_i32_1 = arith.constant 0 : i32
    return %c0_i32, %c0_i32_0 : i32, i32
  }
  func.func @transform_3(%arg0: i32) -> (i32, i32) {
    %c0_i32 = arith.constant 0 : i32
    %c0_i32_0 = arith.constant 0 : i32
    %c0_i32_1 = arith.constant 0 : i32
    return %c0_i32, %c0_i32_0 : i32, i32
  }
  func.func @transform_4(%arg0: i32) -> (i32, i32) {
    %c0_i32 = arith.constant 0 : i32
    %c0_i32_0 = arith.constant 0 : i32
    %c0_i32_1 = arith.constant 0 : i32
    return %c0_i32, %c0_i32_0 : i32, i32
  }
  func.func @transform_5(%arg0: i32) -> (i32, i32) {
    %c0_i32 = arith.constant 0 : i32
    %c0_i32_0 = arith.constant 0 : i32
    %c0_i32_1 = arith.constant 0 : i32
    return %c0_i32, %c0_i32_0 : i32, i32
  }
  func.func @transform_6(%arg0: i32) -> (i32, i32) {
    %c0_i32 = arith.constant 0 : i32
    %c0_i32_0 = arith.constant 0 : i32
    %c0_i32_1 = arith.constant 0 : i32
    return %c0_i32, %c0_i32_0 : i32, i32
  }
  func.func @transform_7(%arg0: i32) -> (i32, i32) {
    %c0_i32 = arith.constant 0 : i32
    %c0_i32_0 = arith.constant 0 : i32
    %c0_i32_1 = arith.constant 0 : i32
    return %c0_i32, %c0_i32_0 : i32, i32
  }
  func.func @transform_8(%arg0: i32) -> (i32, i32) {
    %c0_i32 = arith.constant 0 : i32
    %c0_i32_0 = arith.constant 0 : i32
    %c0_i32_1 = arith.constant 0 : i32
    return %c0_i32, %c0_i32_0 : i32, i32
  }
  func.func @transform_9(%arg0: i32) -> (i32, i32) {
    %c0_i32 = arith.constant 0 : i32
    %c0_i32_0 = arith.constant 0 : i32
    %c0_i32_1 = arith.constant 0 : i32
    return %c0_i32, %c0_i32_0 : i32, i32
  }
  func.func @transform_10(%arg0: i32) -> (i32, i32) {
    %c0_i32 = arith.constant 0 : i32
    %c0_i32_0 = arith.constant 0 : i32
    %c0_i32_1 = arith.constant 0 : i32
    return %c0_i32, %c0_i32_0 : i32, i32
  }
  func.func @transform_11(%arg0: i32) -> (i32, i32) {
    %c0_i32 = arith.constant 0 : i32
    %c0_i32_0 = arith.constant 0 : i32
    %c0_i32_1 = arith.constant 0 : i32
    return %c0_i32, %c0_i32_0 : i32, i32
  }
  func.func @transform_12(%arg0: i32) -> (i32, i32) {
    %c0_i32 = arith.constant 0 : i32
    %c0_i32_0 = arith.constant 0 : i32
    %c0_i32_1 = arith.constant 0 : i32
    return %c0_i32, %c0_i32_0 : i32, i32
  }
  func.func @transform_13(%arg0: i32) -> (i32, i32) {
    %c0_i32 = arith.constant 0 : i32
    %c0_i32_0 = arith.constant 0 : i32
    return %arg0, %c0_i32 : i32, i32
  }
}

module attributes {stable_mosaic.version = 11 : i64} {
  func.func @multihead_bnn_kernel(%arg0: i32, %arg1: memref<16x16xbf16, #tpu.memory_space<vmem>>, %arg2: memref<16x128xbf16, #tpu.memory_space<vmem>>, %arg3: memref<1x128xf32, #tpu.memory_space<vmem>>, %arg4: memref<128x128xbf16, #tpu.memory_space<vmem>>, %arg5: memref<1x128xf32, #tpu.memory_space<vmem>>, %arg6: memref<128x128xbf16, #tpu.memory_space<vmem>>, %arg7: memref<1x128xf32, #tpu.memory_space<vmem>>, %arg8: memref<128x128xbf16, #tpu.memory_space<vmem>>, %arg9: memref<1x128xf32, #tpu.memory_space<vmem>>, %arg10: memref<128x128xbf16, #tpu.memory_space<vmem>>, %arg11: memref<1x128xf32, #tpu.memory_space<vmem>>, %arg12: memref<128x128xbf16, #tpu.memory_space<vmem>>, %arg13: memref<1x128xf32, #tpu.memory_space<vmem>>, %arg14: memref<16x128xf32, #tpu.memory_space<vmem>>) attributes {dimension_semantics = [#tpu.dimension_semantics<parallel>], iteration_bounds = array<i64: 1>, scalar_prefetch = 0 : i64, scratch_operands = 0 : i64, tpu.core_type = #tpu.core_type<tc>, window_params = [{transform_indices = @transform_0, window_bounds = array<i64: 16, 16>}, {pipeline_mode = #tpu.pipeline_mode<synchronous>, transform_indices = @transform_1, window_bounds = array<i64: 16, 128>}, {pipeline_mode = #tpu.pipeline_mode<synchronous>, transform_indices = @transform_2, window_bounds = array<i64: 1, 128>}, {pipeline_mode = #tpu.pipeline_mode<synchronous>, transform_indices = @transform_3, window_bounds = array<i64: 128, 128>}, {pipeline_mode = #tpu.pipeline_mode<synchronous>, transform_indices = @transform_4, window_bounds = array<i64: 1, 128>}, {pipeline_mode = #tpu.pipeline_mode<synchronous>, transform_indices = @transform_5, window_bounds = array<i64: 128, 128>}, {pipeline_mode = #tpu.pipeline_mode<synchronous>, transform_indices = @transform_6, window_bounds = array<i64: 1, 128>}, {pipeline_mode = #tpu.pipeline_mode<synchronous>, transform_indices = @transform_7, window_bounds = array<i64: 128, 128>}, {pipeline_mode = #tpu.pipeline_mode<synchronous>, transform_indices = @transform_8, window_bounds = array<i64: 1, 128>}, {pipeline_mode = #tpu.pipeline_mode<synchronous>, transform_indices = @transform_9, window_bounds = array<i64: 128, 128>}, {pipeline_mode = #tpu.pipeline_mode<synchronous>, transform_indices = @transform_10, window_bounds = array<i64: 1, 128>}, {pipeline_mode = #tpu.pipeline_mode<synchronous>, transform_indices = @transform_11, window_bounds = array<i64: 128, 128>}, {pipeline_mode = #tpu.pipeline_mode<synchronous>, transform_indices = @transform_12, window_bounds = array<i64: 1, 128>}, {transform_indices = @transform_13, window_bounds = array<i64: 16, 128>}]} {
    %c0 = arith.constant 0 : index
    %c0_0 = arith.constant 0 : index
    %0 = vector.load %arg1[%c0, %c0_0] : memref<16x16xbf16, #tpu.memory_space<vmem>>, vector<16x16xbf16>
    %c0_1 = arith.constant 0 : index
    %c0_2 = arith.constant 0 : index
    %1 = vector.load %arg2[%c0_1, %c0_2] : memref<16x128xbf16, #tpu.memory_space<vmem>>, vector<16x128xbf16>
    %cst = arith.constant dense<0.000000e+00> : vector<16x128xf32>
    %2 = tpu.matmul %0, %1, %cst {dimension_numbers = #tpu.dot_dimension_numbers<[1], [0], [0], [1], [0, 0, 1, 1], [], []>} : vector<16x16xbf16>, vector<16x128xbf16>, vector<16x128xf32> -> vector<16x128xf32>
    %c0_3 = arith.constant 0 : index
    %c0_4 = arith.constant 0 : index
    %3 = vector.load %arg3[%c0_3, %c0_4] : memref<1x128xf32, #tpu.memory_space<vmem>>, vector<1x128xf32>
    %4 = vector.broadcast %3 : vector<1x128xf32> to vector<16x128xf32>
    %5 = arith.addf %2, %4 : vector<16x128xf32>
    %cst_5 = arith.constant 0.000000e+00 : f32
    %6 = vector.broadcast %cst_5 : f32 to vector<16x128xf32>
    %7 = arith.maximumf %5, %6 : vector<16x128xf32>
    %8 = arith.truncf %7 : vector<16x128xf32> to vector<16x128xbf16>
    %c0_6 = arith.constant 0 : index
    %c0_7 = arith.constant 0 : index
    %9 = vector.load %arg4[%c0_6, %c0_7] : memref<128x128xbf16, #tpu.memory_space<vmem>>, vector<128x128xbf16>
    %cst_8 = arith.constant dense<0.000000e+00> : vector<16x128xf32>
    %10 = tpu.matmul %8, %9, %cst_8 {dimension_numbers = #tpu.dot_dimension_numbers<[1], [0], [0], [1], [0, 0, 1, 1], [], []>} : vector<16x128xbf16>, vector<128x128xbf16>, vector<16x128xf32> -> vector<16x128xf32>
    %c0_9 = arith.constant 0 : index
    %c0_10 = arith.constant 0 : index
    %11 = vector.load %arg5[%c0_9, %c0_10] : memref<1x128xf32, #tpu.memory_space<vmem>>, vector<1x128xf32>
    %12 = vector.broadcast %11 : vector<1x128xf32> to vector<16x128xf32>
    %13 = arith.addf %10, %12 : vector<16x128xf32>
    %cst_11 = arith.constant 0.000000e+00 : f32
    %14 = vector.broadcast %cst_11 : f32 to vector<16x128xf32>
    %15 = arith.maximumf %13, %14 : vector<16x128xf32>
    %16 = arith.truncf %15 : vector<16x128xf32> to vector<16x128xbf16>
    %c0_12 = arith.constant 0 : index
    %c0_13 = arith.constant 0 : index
    %17 = vector.load %arg6[%c0_12, %c0_13] : memref<128x128xbf16, #tpu.memory_space<vmem>>, vector<128x128xbf16>
    %cst_14 = arith.constant dense<0.000000e+00> : vector<16x128xf32>
    %18 = tpu.matmul %16, %17, %cst_14 {dimension_numbers = #tpu.dot_dimension_numbers<[1], [0], [0], [1], [0, 0, 1, 1], [], []>} : vector<16x128xbf16>, vector<128x128xbf16>, vector<16x128xf32> -> vector<16x128xf32>
    %c0_15 = arith.constant 0 : index
    %c0_16 = arith.constant 0 : index
    %19 = vector.load %arg7[%c0_15, %c0_16] : memref<1x128xf32, #tpu.memory_space<vmem>>, vector<1x128xf32>
    %20 = vector.broadcast %19 : vector<1x128xf32> to vector<16x128xf32>
    %21 = arith.addf %18, %20 : vector<16x128xf32>
    %cst_17 = arith.constant 0.000000e+00 : f32
    %22 = vector.broadcast %cst_17 : f32 to vector<16x128xf32>
    %23 = arith.maximumf %21, %22 : vector<16x128xf32>
    %24 = arith.truncf %23 : vector<16x128xf32> to vector<16x128xbf16>
    %c0_18 = arith.constant 0 : index
    %c0_19 = arith.constant 0 : index
    %25 = vector.load %arg8[%c0_18, %c0_19] : memref<128x128xbf16, #tpu.memory_space<vmem>>, vector<128x128xbf16>
    %cst_20 = arith.constant dense<0.000000e+00> : vector<16x128xf32>
    %26 = tpu.matmul %24, %25, %cst_20 {dimension_numbers = #tpu.dot_dimension_numbers<[1], [0], [0], [1], [0, 0, 1, 1], [], []>} : vector<16x128xbf16>, vector<128x128xbf16>, vector<16x128xf32> -> vector<16x128xf32>
    %c0_21 = arith.constant 0 : index
    %c0_22 = arith.constant 0 : index
    %27 = vector.load %arg9[%c0_21, %c0_22] : memref<1x128xf32, #tpu.memory_space<vmem>>, vector<1x128xf32>
    %28 = vector.broadcast %27 : vector<1x128xf32> to vector<16x128xf32>
    %29 = arith.addf %26, %28 : vector<16x128xf32>
    %cst_23 = arith.constant 0.000000e+00 : f32
    %30 = vector.broadcast %cst_23 : f32 to vector<16x128xf32>
    %31 = arith.maximumf %29, %30 : vector<16x128xf32>
    %32 = arith.truncf %31 : vector<16x128xf32> to vector<16x128xbf16>
    %c0_24 = arith.constant 0 : index
    %c0_25 = arith.constant 0 : index
    %33 = vector.load %arg10[%c0_24, %c0_25] : memref<128x128xbf16, #tpu.memory_space<vmem>>, vector<128x128xbf16>
    %cst_26 = arith.constant dense<0.000000e+00> : vector<16x128xf32>
    %34 = tpu.matmul %32, %33, %cst_26 {dimension_numbers = #tpu.dot_dimension_numbers<[1], [0], [0], [1], [0, 0, 1, 1], [], []>} : vector<16x128xbf16>, vector<128x128xbf16>, vector<16x128xf32> -> vector<16x128xf32>
    %c0_27 = arith.constant 0 : index
    %c0_28 = arith.constant 0 : index
    %35 = vector.load %arg11[%c0_27, %c0_28] : memref<1x128xf32, #tpu.memory_space<vmem>>, vector<1x128xf32>
    %36 = vector.broadcast %35 : vector<1x128xf32> to vector<16x128xf32>
    %37 = arith.addf %34, %36 : vector<16x128xf32>
    %cst_29 = arith.constant 0.000000e+00 : f32
    %38 = vector.broadcast %cst_29 : f32 to vector<16x128xf32>
    %39 = arith.maximumf %37, %38 : vector<16x128xf32>
    %40 = arith.truncf %39 : vector<16x128xf32> to vector<16x128xbf16>
    %c0_30 = arith.constant 0 : index
    %c0_31 = arith.constant 0 : index
    %41 = vector.load %arg12[%c0_30, %c0_31] : memref<128x128xbf16, #tpu.memory_space<vmem>>, vector<128x128xbf16>
    %cst_32 = arith.constant dense<0.000000e+00> : vector<16x128xf32>
    %42 = tpu.matmul %40, %41, %cst_32 {dimension_numbers = #tpu.dot_dimension_numbers<[1], [0], [0], [1], [0, 0, 1, 1], [], []>} : vector<16x128xbf16>, vector<128x128xbf16>, vector<16x128xf32> -> vector<16x128xf32>
    %c0_33 = arith.constant 0 : index
    %c0_34 = arith.constant 0 : index
    %43 = vector.load %arg13[%c0_33, %c0_34] : memref<1x128xf32, #tpu.memory_space<vmem>>, vector<1x128xf32>
    %44 = vector.broadcast %43 : vector<1x128xf32> to vector<16x128xf32>
    %45 = arith.addf %42, %44 : vector<16x128xf32>
    %c0_35 = arith.constant 0 : index
    %c0_36 = arith.constant 0 : index
    %46 = vector.load %arg14[%c0_35, %c0_36] : memref<16x128xf32, #tpu.memory_space<vmem>>, vector<16x128xf32>
    tpu.vector_store %arg14[%c0_35, %c0_36], %45 {strides = array<i32>} : memref<16x128xf32, #tpu.memory_space<vmem>>, vector<16x128xf32>,
    return
  }
  func.func @transform_0(%arg0: i32) -> (i32, i32) {
    %c0_i32 = arith.constant 0 : i32
    %c0_i32_0 = arith.constant 0 : i32
    return %arg0, %c0_i32 : i32, i32
  }
  func.func @transform_1(%arg0: i32) -> (i32, i32) {
    %c0_i32 = arith.constant 0 : i32
    %c0_i32_0 = arith.constant 0 : i32
    %c0_i32_1 = arith.constant 0 : i32
    return %c0_i32, %c0_i32_0 : i32, i32
  }
  func.func @transform_2(%arg0: i32) -> (i32, i32) {
    %c0_i32 = arith.constant 0 : i32
    %c0_i32_0 = arith.constant 0 : i32
    %c0_i32_1 = arith.constant 0 : i32
    return %c0_i32, %c0_i32_0 : i32, i32
  }
  func.func @transform_3(%arg0: i32) -> (i32, i32) {
    %c0_i32 = arith.constant 0 : i32
    %c0_i32_0 = arith.constant 0 : i32
    %c0_i32_1 = arith.constant 0 : i32
    return %c0_i32, %c0_i32_0 : i32, i32
  }
  func.func @transform_4(%arg0: i32) -> (i32, i32) {
    %c0_i32 = arith.constant 0 : i32
    %c0_i32_0 = arith.constant 0 : i32
    %c0_i32_1 = arith.constant 0 : i32
    return %c0_i32, %c0_i32_0 : i32, i32
  }
  func.func @transform_5(%arg0: i32) -> (i32, i32) {
    %c0_i32 = arith.constant 0 : i32
    %c0_i32_0 = arith.constant 0 : i32
    %c0_i32_1 = arith.constant 0 : i32
    return %c0_i32, %c0_i32_0 : i32, i32
  }
  func.func @transform_6(%arg0: i32) -> (i32, i32) {
    %c0_i32 = arith.constant 0 : i32
    %c0_i32_0 = arith.constant 0 : i32
    %c0_i32_1 = arith.constant 0 : i32
    return %c0_i32, %c0_i32_0 : i32, i32
  }
  func.func @transform_7(%arg0: i32) -> (i32, i32) {
    %c0_i32 = arith.constant 0 : i32
    %c0_i32_0 = arith.constant 0 : i32
    %c0_i32_1 = arith.constant 0 : i32
    return %c0_i32, %c0_i32_0 : i32, i32
  }
  func.func @transform_8(%arg0: i32) -> (i32, i32) {
    %c0_i32 = arith.constant 0 : i32
    %c0_i32_0 = arith.constant 0 : i32
    %c0_i32_1 = arith.constant 0 : i32
    return %c0_i32, %c0_i32_0 : i32, i32
  }
  func.func @transform_9(%arg0: i32) -> (i32, i32) {
    %c0_i32 = arith.constant 0 : i32
    %c0_i32_0 = arith.constant 0 : i32
    %c0_i32_1 = arith.constant 0 : i32
    return %c0_i32, %c0_i32_0 : i32, i32
  }
  func.func @transform_10(%arg0: i32) -> (i32, i32) {
    %c0_i32 = arith.constant 0 : i32
    %c0_i32_0 = arith.constant 0 : i32
    %c0_i32_1 = arith.constant 0 : i32
    return %c0_i32, %c0_i32_0 : i32, i32
  }
  func.func @transform_11(%arg0: i32) -> (i32, i32) {
    %c0_i32 = arith.constant 0 : i32
    %c0_i32_0 = arith.constant 0 : i32
    %c0_i32_1 = arith.constant 0 : i32
    return %c0_i32, %c0_i32_0 : i32, i32
  }
  func.func @transform_12(%arg0: i32) -> (i32, i32) {
    %c0_i32 = arith.constant 0 : i32
    %c0_i32_0 = arith.constant 0 : i32
    %c0_i32_1 = arith.constant 0 : i32
    return %c0_i32, %c0_i32_0 : i32, i32
  }
  func.func @transform_13(%arg0: i32) -> (i32, i32) {
    %c0_i32 = arith.constant 0 : i32
    %c0_i32_0 = arith.constant 0 : i32
    return %arg0, %c0_i32 : i32, i32
  }
}

</mosaic_0001>

<bundles_post_ra>
// kernel: tpu_custom_call.1
= control target key start
LH: loop header
LB: loop body
LE: loop exit
PB: predicated region body
PF: predicated region fallthrough
CT: control target
= control target key end

     0   :  { %18 = vsyncpa [#allocation3], 0  ;;  %s1542_s0 = inlined_call_operand.hbm [shape: bf16[16,16], index: 0, kind: input, shape index: {}]   ;;  %s1543_s1 = inlined_call_operand.hbm [shape: bf16[16,128], index: 1, kind: input, shape index: {}]   ;;  %s1544_s2 = inlined_call_operand.vmem [shape: f32[1,128], index: 2, kind: input, shape index: {}]   ;;  %s1545_s3 = inlined_call_operand.hbm [shape: bf16[128,128], index: 3, kind: input, shape index: {}]   ;;  %s1546_s4 = inlined_call_operand.vmem [shape: f32[1,128], index: 4, kind: input, shape index: {}]   ;;  %s1547_s5 = inlined_call_operand.hbm [shape: bf16[128,128], index: 5, kind: input, shape index: {}]   ;;  %s1548_s6 = inlined_call_operand.vmem [shape: f32[1,128], index: 6, kind: input, shape index: {}]   ;;  %s1549_s7 = inlined_call_operand.hbm [shape: bf16[128,128], index: 7, kind: input, shape index: {}]   ;;  %s1550_s8 = inlined_call_operand.vmem [shape: f32[1,128], index: 8, kind: input, shape index: {}]   ;;  %s1551_s9 = inlined_call_operand.hbm [shape: bf16[128,128], index: 9, kind: input, shape index: {}]   ;;  %s1552_s10 = inlined_call_operand.vmem [shape: f32[1,128], index: 10, kind: input, shape index: {}]   ;;  %s1553_s11 = inlined_call_operand.hbm [shape: bf16[128,128], index: 11, kind: input, shape index: {}]   ;;  %s1554_s12 = inlined_call_operand.vmem [shape: f32[1,128], index: 12, kind: input, shape index: {}]   ;;  %s1555_s13 = inlined_call_operand.hbm [shape: f32[16,128], index: 13, kind: output, shape index: {}]  }
   0x1   :  { %19 = vsyncpa [#allocation6], 0 }
   0x2   :  { %20 = vsyncpa [#allocation9], 0 }
   0x3   :  { %21 = vsyncpa [#allocation12], 0 }
   0x4   :  { %22 = vsyncpa [#allocation4], 0  ;;  %s1249_s25 = smov [#allocation5]   ;;  %s1250_s27 = smov [#allocation8]  }
   0x5   :  { %s40_s26 = sshll.u32 %s1249_s25, 4  ;;  %s68_s28 = sshll.u32 %s1250_s27, 4  ;;  %s41_s26 = int_to_ptr.vmem [resolvable:$true] %s40_s26  ;;  %s1333_s28 = int_to_ptr.vmem [resolvable:$true] %s68_s28 }
   0x6   :  { %s1063_s14 = scalar_lea.hbm %s1543_s1, 128 }
   0x7   :  { %p1064_p0 = scmp.ne.s32.totalorder %s1543_s1, %s1063_s14  ;;  %p1067_p1 = scmp.lt.u32.totalorder %s1063_s14, %s1543_s1 }
   0x9   :  { %p1069_p2 = pnand %p1067_p1, %p1064_p0 }
   0xb   :  { %1072 = shalt.err (!%p1069_p2)
}
   0xc   :  { %s1073_s19 = scalar_lea.vmem %s41_s26, 128  ;;  %p1078_p4 = scmp.lt.s32.totalorder %s41_s26, %s41_s26 }
   0xd   :  { %p1074_p3 = scmp.ne.s32.totalorder %s41_s26, %s1073_s19  ;;  %p1079_p5 = scmp.lt.s32.totalorder %s1073_s19, %s1073_s19 }
   0xf   :  { %p1080_p6 = por %p1079_p5, %p1078_p4 }
  0x11   :  { %p1081_p7 = pnand %p1080_p6, %p1074_p3 }
  0x13   :  { %1084 = shalt.err (!%p1081_p7)
}
  0x14   :  { %s1251_s20 = smov 64   ;;  %s1252_s21 = smov 4  }
  0x15   :  { %46 = dma.hbm_to_vmem [thread:$0]  %s1543_s1, 128, %s41_s26, [#allocation6], %s1251_s20, %s1251_s20, %s1252_s21  }
  0x16   :  { %s1085_s27 = scalar_lea.hbm %s1547_s5, 1024 }
  0x17   :  { %p1086_p8 = scmp.ne.s32.totalorder %s1547_s5, %s1085_s27  ;;  %p1089_p9 = scmp.lt.u32.totalorder %s1085_s27, %s1547_s5 }
  0x19   :  { %p1091_p10 = pnand %p1089_p9, %p1086_p8 }
  0x1b   :  { %1094 = shalt.err (!%p1091_p10)
}
  0x1c   :  { %s1095_s16 = scalar_lea.vmem %s1333_s28, 1024  ;;  %p1100_p12 = scmp.lt.s32.totalorder %s1333_s28, %s1333_s28 }
  0x1d   :  { %p1096_p11 = scmp.ne.s32.totalorder %s1333_s28, %s1095_s16  ;;  %p1101_p13 = scmp.lt.s32.totalorder %s1095_s16, %s1095_s16 }
  0x1f   :  { %p1102_p0 = por %p1101_p13, %p1100_p12 }
  0x21   :  { %p1103_p1 = pnand %p1102_p0, %p1096_p11 }
  0x23   :  { %1106 = shalt.err (!%p1103_p1)
}
  0x24   :  { %74 = dma.hbm_to_vmem [thread:$0]  %s1547_s5, 1024, %s1333_s28, [#allocation9], %s1251_s20, %s1251_s20, %s1252_s21  }
  0x25   :  { %s1253_s17 = smov [#allocation11]   ;;  %s1254_s19 = smov [#allocation2]  }
  0x26   :  { %s96_s18 = sshll.u32 %s1253_s17, 4  ;;  %s28_s22 = sshll.u32 %s1254_s19, 4  ;;  %s97_s18 = int_to_ptr.vmem [resolvable:$true] %s96_s18  ;;  %s1370_s22 = int_to_ptr.vmem [resolvable:$true] %s28_s22 }
  0x27   :  { %s1107_s25 = scalar_lea.hbm %s1551_s9, 1024 }
  0x28   :  { %p1108_p2 = scmp.ne.s32.totalorder %s1551_s9, %s1107_s25  ;;  %p1111_p3 = scmp.lt.u32.totalorder %s1107_s25, %s1551_s9 }
  0x2a   :  { %p1113_p4 = pnand %p1111_p3, %p1108_p2 }
  0x2c   :  { %1116 = shalt.err (!%p1113_p4)
}
  0x2d   :  { %s1117_s5 = scalar_lea.vmem %s97_s18, 1024  ;;  %p1122_p6 = scmp.lt.s32.totalorder %s97_s18, %s97_s18 }
  0x2e   :  { %p1118_p5 = scmp.ne.s32.totalorder %s97_s18, %s1117_s5  ;;  %p1123_p7 = scmp.lt.s32.totalorder %s1117_s5, %s1117_s5 }
  0x30   :  { %p1124_p8 = por %p1123_p7, %p1122_p6 }
  0x32   :  { %p1125_p9 = pnand %p1124_p8, %p1118_p5 }
  0x34   :  { %1128 = shalt.err (!%p1125_p9)
}
  0x35   :  { %102 = dma.hbm_to_vmem [thread:$0]  %s1551_s9, 1024, %s97_s18, [#allocation12], %s1251_s20, %s1251_s20, %s1252_s21  }
  0x36   :  { %s1129_s26 = scalar_lea.hbm %s1542_s0, 128 }
  0x37   :  { %p1130_p10 = scmp.ne.s32.totalorder %s1542_s0, %s1129_s26  ;;  %p1133_p11 = scmp.lt.u32.totalorder %s1129_s26, %s1542_s0 }
  0x39   :  { %p1135_p12 = pnand %p1133_p11, %p1130_p10 }
  0x3b   :  { %1138 = shalt.err (!%p1135_p12)
}
  0x3c   :  { %s1139_s25 = scalar_lea.vmem %s1370_s22, 128  ;;  %p1144_p0 = scmp.lt.s32.totalorder %s1370_s22, %s1370_s22 }
  0x3d   :  { %p1140_p13 = scmp.ne.s32.totalorder %s1370_s22, %s1139_s25  ;;  %p1145_p1 = scmp.lt.s32.totalorder %s1139_s25, %s1139_s25 }
  0x3f   :  { %p1146_p2 = por %p1145_p1, %p1144_p0 }
  0x41   :  { %p1147_p3 = pnand %p1146_p2, %p1140_p13 }
  0x43   :  { %1150 = shalt.err (!%p1147_p3)
}
  0x44   :  { %34 = dma.hbm_to_vmem [thread:$0]  %s1542_s0, 128, %s1370_s22, [#allocation3], %s1251_s20, %s1251_s20, %s1252_s21  }
  0x45   :  { %s1255_s27 = smov [#allocation7]   ;;  %s1256_s30 = smov [#allocation10]  }
  0x46   :  { %s54_s29 = sshll.u32 %s1255_s27, 4  ;;  %s82_s14 = sshll.u32 %s1256_s30, 4  ;;  %s55_s29 = int_to_ptr.vmem [resolvable:$true] %s54_s29  ;;  %s1407_s14 = int_to_ptr.vmem [resolvable:$true] %s82_s14 }
  0x47   :  { %s1151_s15 = scalar_lea.hbm %s1545_s3, 1024 }
  0x48   :  { %p1152_p4 = scmp.ne.s32.totalorder %s1545_s3, %s1151_s15  ;;  %p1155_p5 = scmp.lt.u32.totalorder %s1151_s15, %s1545_s3 }
  0x4a   :  { %p1157_p6 = pnand %p1155_p5, %p1152_p4 }
  0x4c   :  { %1160 = shalt.err (!%p1157_p6)
}
  0x4d   :  { %s1161_s0 = scalar_lea.vmem %s55_s29, 1024  ;;  %p1166_p8 = scmp.lt.s32.totalorder %s55_s29, %s55_s29 }
  0x4e   :  { %p1162_p7 = scmp.ne.s32.totalorder %s55_s29, %s1161_s0  ;;  %p1167_p9 = scmp.lt.s32.totalorder %s1161_s0, %s1161_s0 }
  0x50   :  { %p1168_p10 = por %p1167_p9, %p1166_p8 }
  0x52   :  { %p1169_p11 = pnand %p1168_p10, %p1162_p7 }
  0x54   :  { %1172 = shalt.err (!%p1169_p11)
}
  0x55   :  { %60 = dma.hbm_to_vmem [thread:$0]  %s1545_s3, 1024, %s55_s29, [#allocation6], %s1251_s20, %s1251_s20, %s1252_s21  }
  0x56   :  { %s1173_s25 = scalar_lea.hbm %s1549_s7, 1024 }
  0x57   :  { %p1174_p12 = scmp.ne.s32.totalorder %s1549_s7, %s1173_s25  ;;  %p1177_p13 = scmp.lt.u32.totalorder %s1173_s25, %s1549_s7 }
  0x59   :  { %p1179_p0 = pnand %p1177_p13, %p1174_p12 }
  0x5b   :  { %1182 = shalt.err (!%p1179_p0)
}
  0x5c   :  { %s1183_s5 = scalar_lea.vmem %s1407_s14, 1024  ;;  %p1188_p2 = scmp.lt.s32.totalorder %s1407_s14, %s1407_s14 }
  0x5d   :  { %p1184_p1 = scmp.ne.s32.totalorder %s1407_s14, %s1183_s5  ;;  %p1189_p3 = scmp.lt.s32.totalorder %s1183_s5, %s1183_s5 }
  0x5f   :  { %p1190_p4 = por %p1189_p3, %p1188_p2 }
  0x61   :  { %p1191_p5 = pnand %p1190_p4, %p1184_p1 }
  0x63   :  { %1194 = shalt.err (!%p1191_p5)
}
  0x64   :  { %88 = dma.hbm_to_vmem [thread:$0]  %s1549_s7, 1024, %s1407_s14, [#allocation9], %s1251_s20, %s1251_s20, %s1252_s21  }
  0x65   :  { %s1257_s28 = smov [#allocation13]   ;;  %s1195_s26 = scalar_lea.hbm %s1553_s11, 1024 }
  0x66   :  { %s110_s15 = sshll.u32 %s1257_s28, 4  ;;  %p1196_p6 = scmp.ne.s32.totalorder %s1553_s11, %s1195_s26  ;;  %s111_s15 = int_to_ptr.vmem [resolvable:$true] %s110_s15 }
  0x67   :  { %p1199_p7 = scmp.lt.u32.totalorder %s1195_s26, %s1553_s11 }
  0x69   :  { %p1201_p8 = pnand %p1199_p7, %p1196_p6 }
  0x6b   :  { %1204 = shalt.err (!%p1201_p8)
}
  0x6c   :  { %s1205_s23 = scalar_lea.vmem %s111_s15, 1024  ;;  %p1210_p10 = scmp.lt.s32.totalorder %s111_s15, %s111_s15 }
  0x6d   :  { %p1206_p9 = scmp.ne.s32.totalorder %s111_s15, %s1205_s23  ;;  %p1211_p11 = scmp.lt.s32.totalorder %s1205_s23, %s1205_s23 }
  0x6f   :  { %p1212_p12 = por %p1211_p11, %p1210_p10 }
  0x71   :  { %p1213_p13 = pnand %p1212_p12, %p1206_p9 }
  0x73   :  { %1216 = shalt.err (!%p1213_p13)
}
  0x74   :  { %116 = dma.hbm_to_vmem [thread:$0]  %s1553_s11, 1024, %s111_s15, [#allocation12], %s1251_s20, %s1251_s20, %s1252_s21  }
  0x75   :  { %1239 = dma.done.wait [#allocation3], 128  }
  0x76   :  { %1240 = vsyncadd [#allocation3], 4294967168 }
  0x77   :  { %1241 = dma.done.wait [#allocation6], 1152  }
  0x78   :  { %1242 = vsyncadd [#allocation6], 4294966144 }
  0x79   :  { %1243 = dma.done.wait [#allocation9], 2048  }
  0x7a   :  { %1244 = vsyncadd [#allocation9], 4294965248 }
  0x7b   :  { %1245 = dma.done.wait [#allocation12], 2048  }
  0x7c   :  { %1246 = vsyncadd [#allocation12], 4294965248  ;;  %v1258_v0 = vmov 0.0   ;;  %vm1259_vm0 = vmmov 0   ;;  %v1021_v1 = vld [vmem:[#allocation5] sm:$0xff]   ;;  %v1022_v2 = vld [vmem:[#allocation2] sm:$0xff]  }
  0x7d   :  { %901 = vmatprep.subr.bf16.mxu0 %v1258_v0  ;;  %903 = vmatprep.mubr.msk.bf16.mxu0 %vm1259_vm0, %v1258_v0  ;;  %vm163_vm1 = vcmask 130048   ;;  %v1023_v3 = vld [vmem:[#allocation7] sm:$0xff]   ;;  %v1024_v4 = vld [vmem:[#allocation7 + $0x8] sm:$0xff]   ;;  %v1025_v5 = vld [vmem:[#allocation7 + $0x10] sm:$0xff]   ;;  %s1260_s30 = smov [#allocation14]  }
  0x7e   :  { %907 = vmatprep.subr.bf16.mxu1 %v1258_v0  ;;  %923 = vmatprep.mubr.msk.bf16.mxu1 %vm1259_vm0, %v1258_v0  ;;  %v1026_v6 = vld [vmem:[#allocation7 + $0x18] sm:$0xff]   ;;  %v1027_v7 = vld [vmem:[#allocation7 + $0x20] sm:$0xff]   ;;  %v1028_v8 = vld [vmem:[#allocation7 + $0x28] sm:$0xff]   ;;  %s790_s5 = sshll.u32 %s1260_s30, 4  ;;  %s791_s5 = int_to_ptr.vmem [resolvable:$true] %s790_s5 }
  0x7f   :  { %902 = vmatpush3.bf16.msra.mxu0 %v1021_v1  ;;  %908 = vmatpush3.bf16.msra.mxu1 %v1023_v3  ;;  %v1029_v9 = vld [vmem:[#allocation7 + $0x30] sm:$0xff]   ;;  %v1030_v10 = vld [vmem:[#allocation7 + $0x38] sm:$0xff]   ;;  %v1031_v11 = vld [vmem:[#allocation8] sm:$0xff]   ;;  %p1222_p1 = scmp.lt.s32.totalorder %s791_s5, %s791_s5 }
  0x80   :  { %927 = vmatprep.subr.bf16.mxu0 %v1258_v0  ;;  %909 = vmatprep.subr.bf16.mxu1 %v1258_v0  ;;  %v1032_v12 = vld [vmem:[#allocation8 + $0x8] sm:$0xff]   ;;  %v1033_v13 = vld [vmem:[#allocation8 + $0x10] sm:$0xff]   ;;  %v1034_v14 = vld [vmem:[#allocation8 + $0x18] sm:$0xff]  }
  0x81   :  { %v1035_v15 = vld [vmem:[#allocation8 + $0x20] sm:$0xff]   ;;  %v1036_v16 = vld [vmem:[#allocation8 + $0x28] sm:$0xff]   ;;  %v805_v17 = vld [vmem:[%s1544_s2] ss:$0 sm:$0xff] }
  0x82   :  { %904 = vmatmul.mubr.msk.bf16.vlgmr.msra.gmra.mrb[0].mxu0 %vm163_vm1, %v1022_v2  ;;  %v1037_v27 = vld [vmem:[#allocation8 + $0x30] sm:$0xff]   ;;  %v1038_v28 = vld [vmem:[#allocation8 + $0x38] sm:$0xff]   ;;  %v1039_v29 = vld [vmem:[#allocation10] sm:$0xff]  }
  0x83   :  { %943 = vmatprep.mubr.msk.bf16.mxu0 %vm1259_vm0, %v1258_v0  ;;  %910 = vmatpush3.bf16.msra.mxu1 %v1024_v4  ;;  %v1040_v30 = vld [vmem:[#allocation10 + $0x8] sm:$0xff]   ;;  %v1041_v31 = vld [vmem:[#allocation10 + $0x10] sm:$0xff]   ;;  %v1042_v32 = vld [vmem:[#allocation10 + $0x18] sm:$0xff]  }
  0x84   :  { %911 = vmatprep.subr.bf16.mxu1 %v1258_v0  ;;  %928 = vmatpush3.bf16.msra.mxu0 %v1031_v11  ;;  %v1043_v33 = vld [vmem:[#allocation10 + $0x20] sm:$0xff]   ;;  %v1044_v34 = vld [vmem:[#allocation10 + $0x28] sm:$0xff]   ;;  %v809_v35 = vld [vmem:[%s1546_s4] ss:$0 sm:$0xff] }
  0x85   :  { %929 = vmatprep.subr.bf16.mxu0 %v1258_v0  ;;  %v1045_v45 = vld [vmem:[#allocation10 + $0x30] sm:$0xff]   ;;  %v1046_v46 = vld [vmem:[#allocation10 + $0x38] sm:$0xff]   ;;  %v1047_v47 = vld [vmem:[#allocation11] sm:$0xff]  }
  0x86   :  { %v1048_v48 = vld [vmem:[#allocation11 + $0x8] sm:$0xff]   ;;  %v1049_v49 = vld [vmem:[#allocation11 + $0x10] sm:$0xff]   ;;  %v1050_v50 = vld [vmem:[#allocation11 + $0x18] sm:$0xff]  }
  0x87   :  { %912 = vmatpush3.bf16.msra.mxu1 %v1025_v5  ;;  %v1051_v51 = vld [vmem:[#allocation11 + $0x20] sm:$0xff]   ;;  %v1052_v52 = vld [vmem:[#allocation11 + $0x28] sm:$0xff]   ;;  %v818_v53 = vld [vmem:[%s1548_s6] ss:$0 sm:$0xff] }
  0x88   :  { %913 = vmatprep.subr.bf16.mxu1 %v1258_v0  ;;  %930 = vmatpush3.bf16.msra.mxu0 %v1032_v12  ;;  %v1053_v63 = vld [vmem:[#allocation11 + $0x30] sm:$0xff]   ;;  %v1054_v1 = vld [vmem:[#allocation11 + $0x38] sm:$0xff]   ;;  %v1055_v2 = vld [vmem:[#allocation13] sm:$0xff]  }
  0x89   :  { %931 = vmatprep.subr.bf16.mxu0 %v1258_v0  ;;  %v1056_v3 = vld [vmem:[#allocation13 + $0x8] sm:$0xff]   ;;  %v1057_v4 = vld [vmem:[#allocation13 + $0x10] sm:$0xff]   ;;  %v1058_v5 = vld [vmem:[#allocation13 + $0x18] sm:$0xff]  }
  0x8b   :  { %914 = vmatpush3.bf16.msra.mxu1 %v1026_v6  ;;  %v1059_v6 = vld [vmem:[#allocation13 + $0x20] sm:$0xff]  }
  0x8c   :  { %915 = vmatprep.subr.bf16.mxu1 %v1258_v0  ;;  %932 = vmatpush3.bf16.msra.mxu0 %v1033_v13 }
  0x8d   :  { %933 = vmatprep.subr.bf16.mxu0 %v1258_v0 }
  0x8f   :  { %916 = vmatpush3.bf16.msra.mxu1 %v1027_v7  ;;  %v1060_v7 = vld [vmem:[#allocation13 + $0x28] sm:$0xff]  }
  0x90   :  { %917 = vmatprep.subr.bf16.mxu1 %v1258_v0  ;;  %934 = vmatpush3.bf16.msra.mxu0 %v1034_v14 }
  0x91   :  { %935 = vmatprep.subr.bf16.mxu0 %v1258_v0 }
  0x93   :  { %918 = vmatpush3.bf16.msra.mxu1 %v1028_v8  ;;  %v827_v8 = vld [vmem:[%s1550_s8] ss:$0 sm:$0xff] }
  0x94   :  { %919 = vmatprep.subr.bf16.mxu1 %v1258_v0  ;;  %936 = vmatpush3.bf16.msra.mxu0 %v1035_v15 }
  0x95   :  { %937 = vmatprep.subr.bf16.mxu0 %v1258_v0 }
  0x97   :  { %920 = vmatpush3.bf16.msra.mxu1 %v1029_v9 }
  0x98   :  { %921 = vmatprep.subr.bf16.mxu1 %v1258_v0  ;;  %938 = vmatpush3.bf16.msra.mxu0 %v1036_v16 }
  0x99   :  { %939 = vmatprep.subr.bf16.mxu0 %v1258_v0 }
  0x9b   :  { %922 = vmatpush3.bf16.msra.mxu1 %v1030_v10 }
  0x9c   :  { %947 = vmatprep.subr.bf16.mxu1 %v1258_v0  ;;  %940 = vmatpush3.bf16.msra.mxu0 %v1037_v27 }
  0x9d   :  { %941 = vmatprep.subr.bf16.mxu0 %v1258_v0 }
  0xa0   :  { %942 = vmatpush3.bf16.msra.mxu0 %v1038_v28 }
  0xa1   :  { %967 = vmatprep.subr.bf16.mxu0 %v1258_v0 }
 0x155   :  { %v201_v18 = vpop.f32.mrb[0].mxu0 }
 0x156   :  { %v202_v19 = vadd.f32 %v805_v17, %v201_v18  ;;  %v905_v20 = vpop.f32.mrb[1].mxu0  ;;  %v1061_v18 = vld [vmem:[#allocation13 + $0x30] sm:$0xff]  }
 0x157   :  { %v204_v21 = vpop.f32.mrb[2].mxu0  ;;  %v836_v20 = vld [vmem:[%s1552_s10] ss:$0 sm:$0xff]  ;;  %s1217_s10 = scalar_lea.vmem %s791_s5, 256 }
 0x158   :  { %v205_v22 = vadd.f32 %v805_v17, %v204_v21  ;;  %v906_v23 = vpop.f32.mrb[3].mxu0  ;;  %v208_v24 = vmax.f32 %v202_v19, 0.0  ;;  %v1062_v19 = vld [vmem:[#allocation13 + $0x38] sm:$0xff]   ;;  %p1218_p0 = scmp.ne.s32.totalorder %s791_s5, %s1217_s10  ;;  %p1223_p2 = scmp.lt.s32.totalorder %s1217_s10, %s1217_s10 }
 0x15a   :  { %v209_v25 = vmax.f32 %v205_v22, 0.0  ;;  %p1224_p3 = por %p1223_p2, %p1222_p1 }
 0x15c   :  { %v210_v26 = vpack.c.bf16 %v209_v25, %v208_v24  ;;  %p1225_p4 = pnand %p1224_p3, %p1218_p0 }
 0x15e   :  { %924 = vmatmul.mubr.bf16.vlgmr.msra.gmra.mrb[0].mxu1 %v210_v26 }
 0x15f   :  { %963 = vmatprep.mubr.msk.bf16.mxu1 %vm1259_vm0, %v1258_v0  ;;  %948 = vmatpush3.bf16.msra.mxu1 %v1039_v29 }
 0x160   :  { %949 = vmatprep.subr.bf16.mxu1 %v1258_v0 }
 0x163   :  { %950 = vmatpush3.bf16.msra.mxu1 %v1040_v30 }
 0x164   :  { %951 = vmatprep.subr.bf16.mxu1 %v1258_v0 }
 0x167   :  { %952 = vmatpush3.bf16.msra.mxu1 %v1041_v31 }
 0x168   :  { %953 = vmatprep.subr.bf16.mxu1 %v1258_v0 }
 0x16b   :  { %954 = vmatpush3.bf16.msra.mxu1 %v1042_v32 }
 0x16c   :  { %955 = vmatprep.subr.bf16.mxu1 %v1258_v0 }
 0x16f   :  { %956 = vmatpush3.bf16.msra.mxu1 %v1043_v33 }
 0x170   :  { %957 = vmatprep.subr.bf16.mxu1 %v1258_v0 }
 0x173   :  { %958 = vmatpush3.bf16.msra.mxu1 %v1044_v34 }
 0x174   :  { %959 = vmatprep.subr.bf16.mxu1 %v1258_v0 }
 0x177   :  { %960 = vmatpush3.bf16.msra.mxu1 %v1045_v45 }
 0x178   :  { %961 = vmatprep.subr.bf16.mxu1 %v1258_v0 }
 0x17b   :  { %962 = vmatpush3.bf16.msra.mxu1 %v1046_v46 }
 0x17c   :  { %987 = vmatprep.subr.bf16.mxu1 %v1258_v0 }
 0x231   :  { %v316_v36 = vpop.f32.mrb[0].mxu1 }
 0x232   :  { %v317_v37 = vadd.f32 %v809_v35, %v316_v36  ;;  %v925_v38 = vpop.f32.mrb[1].mxu1 }
 0x233   :  { %v319_v39 = vpop.f32.mrb[2].mxu1 }
 0x234   :  { %v320_v40 = vadd.f32 %v809_v35, %v319_v39  ;;  %v926_v41 = vpop.f32.mrb[3].mxu1  ;;  %v323_v42 = vmax.f32 %v317_v37, 0.0 }
 0x236   :  { %v324_v43 = vmax.f32 %v320_v40, 0.0 }
 0x238   :  { %v325_v44 = vpack.c.bf16 %v324_v43, %v323_v42 }
 0x23a   :  { %944 = vmatmul.mubr.bf16.vlgmr.msra.gmra.mrb[4].mxu0 %v325_v44 }
 0x23b   :  { %983 = vmatprep.mubr.msk.bf16.mxu0 %vm1259_vm0, %v1258_v0  ;;  %968 = vmatpush3.bf16.msra.mxu0 %v1047_v47 }
 0x23c   :  { %969 = vmatprep.subr.bf16.mxu0 %v1258_v0 }
 0x23f   :  { %970 = vmatpush3.bf16.msra.mxu0 %v1048_v48 }
 0x240   :  { %971 = vmatprep.subr.bf16.mxu0 %v1258_v0 }
 0x243   :  { %972 = vmatpush3.bf16.msra.mxu0 %v1049_v49 }
 0x244   :  { %973 = vmatprep.subr.bf16.mxu0 %v1258_v0 }
 0x247   :  { %974 = vmatpush3.bf16.msra.mxu0 %v1050_v50 }
 0x248   :  { %975 = vmatprep.subr.bf16.mxu0 %v1258_v0 }
 0x24b   :  { %976 = vmatpush3.bf16.msra.mxu0 %v1051_v51 }
 0x24c   :  { %977 = vmatprep.subr.bf16.mxu0 %v1258_v0 }
 0x24f   :  { %978 = vmatpush3.bf16.msra.mxu0 %v1052_v52 }
 0x250   :  { %979 = vmatprep.subr.bf16.mxu0 %v1258_v0 }
 0x253   :  { %980 = vmatpush3.bf16.msra.mxu0 %v1053_v63 }
 0x254   :  { %981 = vmatprep.subr.bf16.mxu0 %v1258_v0 }
 0x257   :  { %982 = vmatpush3.bf16.msra.mxu0 %v1054_v1 }
 0x30d   :  { %v431_v54 = vpop.f32.mrb[4].mxu0 }
 0x30e   :  { %v432_v55 = vadd.f32 %v818_v53, %v431_v54  ;;  %v945_v56 = vpop.f32.mrb[5].mxu0 }
 0x30f   :  { %v434_v57 = vpop.f32.mrb[6].mxu0 }
 0x310   :  { %v435_v58 = vadd.f32 %v818_v53, %v434_v57  ;;  %v946_v59 = vpop.f32.mrb[7].mxu0  ;;  %v438_v60 = vmax.f32 %v432_v55, 0.0 }
 0x312   :  { %v439_v61 = vmax.f32 %v435_v58, 0.0 }
 0x314   :  { %v440_v62 = vpack.c.bf16 %v439_v61, %v438_v60 }
 0x316   :  { %964 = vmatmul.mubr.bf16.vlgmr.msra.gmra.mrb[4].mxu1 %v440_v62 }
 0x317   :  { %1003 = vmatprep.mubr.msk.bf16.mxu1 %vm1259_vm0, %v1258_v0  ;;  %988 = vmatpush3.bf16.msra.mxu1 %v1055_v2 }
 0x318   :  { %989 = vmatprep.subr.bf16.mxu1 %v1258_v0 }
 0x31b   :  { %990 = vmatpush3.bf16.msra.mxu1 %v1056_v3 }
 0x31c   :  { %991 = vmatprep.subr.bf16.mxu1 %v1258_v0 }
 0x31f   :  { %992 = vmatpush3.bf16.msra.mxu1 %v1057_v4 }
 0x320   :  { %993 = vmatprep.subr.bf16.mxu1 %v1258_v0 }
 0x323   :  { %994 = vmatpush3.bf16.msra.mxu1 %v1058_v5 }
 0x324   :  { %995 = vmatprep.subr.bf16.mxu1 %v1258_v0 }
 0x327   :  { %996 = vmatpush3.bf16.msra.mxu1 %v1059_v6 }
 0x328   :  { %997 = vmatprep.subr.bf16.mxu1 %v1258_v0 }
 0x32b   :  { %998 = vmatpush3.bf16.msra.mxu1 %v1060_v7 }
 0x32c   :  { %999 = vmatprep.subr.bf16.mxu1 %v1258_v0 }
 0x32f   :  { %1000 = vmatpush3.bf16.msra.mxu1 %v1061_v18 }
 0x330   :  { %1001 = vmatprep.subr.bf16.mxu1 %v1258_v0  ;;  %v845_v0 = vld [vmem:[%s1554_s12] ss:$0 sm:$0xff] }
 0x333   :  { %1002 = vmatpush3.bf16.msra.mxu1 %v1062_v19 }
 0x3e9   :  { %v546_v9 = vpop.f32.mrb[4].mxu1 }
 0x3ea   :  { %v547_v10 = vadd.f32 %v827_v8, %v546_v9  ;;  %v965_v11 = vpop.f32.mrb[5].mxu1 }
 0x3eb   :  { %v549_v12 = vpop.f32.mrb[6].mxu1 }
 0x3ec   :  { %v550_v13 = vadd.f32 %v827_v8, %v549_v12  ;;  %v966_v14 = vpop.f32.mrb[7].mxu1  ;;  %v553_v15 = vmax.f32 %v547_v10, 0.0 }
 0x3ee   :  { %v554_v16 = vmax.f32 %v550_v13, 0.0 }
 0x3f0   :  { %v555_v17 = vpack.c.bf16 %v554_v16, %v553_v15 }
 0x3f2   :  { %984 = vmatmul.mubr.bf16.vlgmr.msra.gmra.mrb[8].mxu0 %v555_v17 }
 0x4c5   :  { %v661_v21 = vpop.f32.mrb[8].mxu0 }
 0x4c6   :  { %v662_v22 = vadd.f32 %v836_v20, %v661_v21  ;;  %v985_v23 = vpop.f32.mrb[9].mxu0 }
 0x4c7   :  { %v664_v24 = vpop.f32.mrb[10].mxu0 }
 0x4c8   :  { %v665_v25 = vadd.f32 %v836_v20, %v664_v24  ;;  %v986_v26 = vpop.f32.mrb[11].mxu0  ;;  %v668_v27 = vmax.f32 %v662_v22, 0.0 }
 0x4ca   :  { %v669_v28 = vmax.f32 %v665_v25, 0.0 }
 0x4cc   :  { %v670_v29 = vpack.c.bf16 %v669_v28, %v668_v27 }
 0x4ce   :  { %1004 = vmatmul.mubr.bf16.vlgmr.msra.gmra.mrb[8].mxu1 %v670_v29 }
 0x5a1   :  { %v776_v30 = vpop.f32.mrb[8].mxu1 }
 0x5a2   :  { %v777_v31 = vadd.f32 %v845_v0, %v776_v30  ;;  %v1005_v32 = vpop.f32.mrb[9].mxu1 }
 0x5a3   :  { %v779_v33 = vpop.f32.mrb[10].mxu1 }
 0x5a4   :  { %783 = vst [vmem:[#allocation14] sm:$0xff] %v777_v31  ;;  %v780_v34 = vadd.f32 %v845_v0, %v779_v33  ;;  %v1006_v35 = vpop.f32.mrb[11].mxu1 }
 0x5a6   :  { %784 = vst [vmem:[#allocation14 + $0x8] sm:$0xff] %v780_v34 }
 0x5a7   :  { %1228 = shalt.err (!%p1225_p4)
}
 0x5a8   :  { %s1229_s29 = scalar_lea.hbm %s1555_s13, 256 }
 0x5a9   :  { %p1230_p5 = scmp.ne.s32.totalorder %s1555_s13, %s1229_s29  ;;  %p1233_p6 = scmp.lt.u32.totalorder %s1229_s29, %s1555_s13 }
 0x5ab   :  { %p1235_p7 = pnand %p1233_p6, %p1230_p5 }
 0x5ad   :  { %1238 = shalt.err (!%p1235_p7)
}
 0x5ae   :  { %s1261_s26 = smov 128   ;;  %s1262_s17 = smov 8  }
 0x5af   :  { %796 = dma.vmem_to_hbm [thread:$0]  %s791_s5, 256, %s1555_s13, [#allocation4], %s1261_s26, %s1261_s26, %s1262_s17  }
 0x5b0   :  { %1247 = dma.done.wait [#allocation4], 256  }
 0x5b1   :  { %1248 = vsyncadd [#allocation4], 4294967040 }
 0x5b2   :  { %800 = vsyncpa [#allocation3], 1 }
 0x5b3   :  { %801 = vsyncpa [#allocation6], 1 }
 0x5b4   :  { %802 = vsyncpa [#allocation9], 1 }
 0x5b5   :  { %803 = vsyncpa [#allocation12], 1 }
 0x5b6   :  { %804 = vsyncpa [#allocation4], 1 }

// kernel: tpu_custom_call.1
= control target key start
LH: loop header
LB: loop body
LE: loop exit
PB: predicated region body
PF: predicated region fallthrough
CT: control target
= control target key end

     0   :  { %18 = vsyncpa [#allocation3], 0  ;;  %s1542_s0 = inlined_call_operand.hbm [shape: bf16[16,16], index: 0, kind: input, shape index: {}]   ;;  %s1543_s1 = inlined_call_operand.hbm [shape: bf16[16,128], index: 1, kind: input, shape index: {}]   ;;  %s1544_s2 = inlined_call_operand.vmem [shape: f32[1,128], index: 2, kind: input, shape index: {}]   ;;  %s1545_s3 = inlined_call_operand.hbm [shape: bf16[128,128], index: 3, kind: input, shape index: {}]   ;;  %s1546_s4 = inlined_call_operand.vmem [shape: f32[1,128], index: 4, kind: input, shape index: {}]   ;;  %s1547_s5 = inlined_call_operand.hbm [shape: bf16[128,128], index: 5, kind: input, shape index: {}]   ;;  %s1548_s6 = inlined_call_operand.vmem [shape: f32[1,128], index: 6, kind: input, shape index: {}]   ;;  %s1549_s7 = inlined_call_operand.hbm [shape: bf16[128,128], index: 7, kind: input, shape index: {}]   ;;  %s1550_s8 = inlined_call_operand.vmem [shape: f32[1,128], index: 8, kind: input, shape index: {}]   ;;  %s1551_s9 = inlined_call_operand.hbm [shape: bf16[128,128], index: 9, kind: input, shape index: {}]   ;;  %s1552_s10 = inlined_call_operand.vmem [shape: f32[1,128], index: 10, kind: input, shape index: {}]   ;;  %s1553_s11 = inlined_call_operand.hbm [shape: bf16[128,128], index: 11, kind: input, shape index: {}]   ;;  %s1554_s12 = inlined_call_operand.vmem [shape: f32[1,128], index: 12, kind: input, shape index: {}]   ;;  %s1555_s13 = inlined_call_operand.hbm [shape: f32[16,128], index: 13, kind: output, shape index: {}]  }
   0x1   :  { %19 = vsyncpa [#allocation6], 0 }
   0x2   :  { %20 = vsyncpa [#allocation9], 0 }
   0x3   :  { %21 = vsyncpa [#allocation12], 0 }
   0x4   :  { %22 = vsyncpa [#allocation4], 0  ;;  %s1249_s25 = smov [#allocation5]   ;;  %s1250_s27 = smov [#allocation8]  }
   0x5   :  { %s40_s26 = sshll.u32 %s1249_s25, 4  ;;  %s68_s28 = sshll.u32 %s1250_s27, 4  ;;  %s41_s26 = int_to_ptr.vmem [resolvable:$true] %s40_s26  ;;  %s1333_s28 = int_to_ptr.vmem [resolvable:$true] %s68_s28 }
   0x6   :  { %s1063_s14 = scalar_lea.hbm %s1543_s1, 128 }
   0x7   :  { %p1064_p0 = scmp.ne.s32.totalorder %s1543_s1, %s1063_s14  ;;  %p1067_p1 = scmp.lt.u32.totalorder %s1063_s14, %s1543_s1 }
   0x9   :  { %p1069_p2 = pnand %p1067_p1, %p1064_p0 }
   0xb   :  { %1072 = shalt.err (!%p1069_p2)
}
   0xc   :  { %s1073_s19 = scalar_lea.vmem %s41_s26, 128  ;;  %p1078_p4 = scmp.lt.s32.totalorder %s41_s26, %s41_s26 }
   0xd   :  { %p1074_p3 = scmp.ne.s32.totalorder %s41_s26, %s1073_s19  ;;  %p1079_p5 = scmp.lt.s32.totalorder %s1073_s19, %s1073_s19 }
   0xf   :  { %p1080_p6 = por %p1079_p5, %p1078_p4 }
  0x11   :  { %p1081_p7 = pnand %p1080_p6, %p1074_p3 }
  0x13   :  { %1084 = shalt.err (!%p1081_p7)
}
  0x14   :  { %s1251_s20 = smov 64   ;;  %s1252_s21 = smov 4  }
  0x15   :  { %46 = dma.hbm_to_vmem [thread:$0]  %s1543_s1, 128, %s41_s26, [#allocation6], %s1251_s20, %s1251_s20, %s1252_s21  }
  0x16   :  { %s1085_s27 = scalar_lea.hbm %s1547_s5, 1024 }
  0x17   :  { %p1086_p8 = scmp.ne.s32.totalorder %s1547_s5, %s1085_s27  ;;  %p1089_p9 = scmp.lt.u32.totalorder %s1085_s27, %s1547_s5 }
  0x19   :  { %p1091_p10 = pnand %p1089_p9, %p1086_p8 }
  0x1b   :  { %1094 = shalt.err (!%p1091_p10)
}
  0x1c   :  { %s1095_s16 = scalar_lea.vmem %s1333_s28, 1024  ;;  %p1100_p12 = scmp.lt.s32.totalorder %s1333_s28, %s1333_s28 }
  0x1d   :  { %p1096_p11 = scmp.ne.s32.totalorder %s1333_s28, %s1095_s16  ;;  %p1101_p13 = scmp.lt.s32.totalorder %s1095_s16, %s1095_s16 }
  0x1f   :  { %p1102_p0 = por %p1101_p13, %p1100_p12 }
  0x21   :  { %p1103_p1 = pnand %p1102_p0, %p1096_p11 }
  0x23   :  { %1106 = shalt.err (!%p1103_p1)
}
  0x24   :  { %74 = dma.hbm_to_vmem [thread:$0]  %s1547_s5, 1024, %s1333_s28, [#allocation9], %s1251_s20, %s1251_s20, %s1252_s21  }
  0x25   :  { %s1253_s17 = smov [#allocation11]   ;;  %s1254_s19 = smov [#allocation2]  }
  0x26   :  { %s96_s18 = sshll.u32 %s1253_s17, 4  ;;  %s28_s22 = sshll.u32 %s1254_s19, 4  ;;  %s97_s18 = int_to_ptr.vmem [resolvable:$true] %s96_s18  ;;  %s1370_s22 = int_to_ptr.vmem [resolvable:$true] %s28_s22 }
  0x27   :  { %s1107_s25 = scalar_lea.hbm %s1551_s9, 1024 }
  0x28   :  { %p1108_p2 = scmp.ne.s32.totalorder %s1551_s9, %s1107_s25  ;;  %p1111_p3 = scmp.lt.u32.totalorder %s1107_s25, %s1551_s9 }
  0x2a   :  { %p1113_p4 = pnand %p1111_p3, %p1108_p2 }
  0x2c   :  { %1116 = shalt.err (!%p1113_p4)
}
  0x2d   :  { %s1117_s5 = scalar_lea.vmem %s97_s18, 1024  ;;  %p1122_p6 = scmp.lt.s32.totalorder %s97_s18, %s97_s18 }
  0x2e   :  { %p1118_p5 = scmp.ne.s32.totalorder %s97_s18, %s1117_s5  ;;  %p1123_p7 = scmp.lt.s32.totalorder %s1117_s5, %s1117_s5 }
  0x30   :  { %p1124_p8 = por %p1123_p7, %p1122_p6 }
  0x32   :  { %p1125_p9 = pnand %p1124_p8, %p1118_p5 }
  0x34   :  { %1128 = shalt.err (!%p1125_p9)
}
  0x35   :  { %102 = dma.hbm_to_vmem [thread:$0]  %s1551_s9, 1024, %s97_s18, [#allocation12], %s1251_s20, %s1251_s20, %s1252_s21  }
  0x36   :  { %s1129_s26 = scalar_lea.hbm %s1542_s0, 128 }
  0x37   :  { %p1130_p10 = scmp.ne.s32.totalorder %s1542_s0, %s1129_s26  ;;  %p1133_p11 = scmp.lt.u32.totalorder %s1129_s26, %s1542_s0 }
  0x39   :  { %p1135_p12 = pnand %p1133_p11, %p1130_p10 }
  0x3b   :  { %1138 = shalt.err (!%p1135_p12)
}
  0x3c   :  { %s1139_s25 = scalar_lea.vmem %s1370_s22, 128  ;;  %p1144_p0 = scmp.lt.s32.totalorder %s1370_s22, %s1370_s22 }
  0x3d   :  { %p1140_p13 = scmp.ne.s32.totalorder %s1370_s22, %s1139_s25  ;;  %p1145_p1 = scmp.lt.s32.totalorder %s1139_s25, %s1139_s25 }
  0x3f   :  { %p1146_p2 = por %p1145_p1, %p1144_p0 }
  0x41   :  { %p1147_p3 = pnand %p1146_p2, %p1140_p13 }
  0x43   :  { %1150 = shalt.err (!%p1147_p3)
}
  0x44   :  { %34 = dma.hbm_to_vmem [thread:$0]  %s1542_s0, 128, %s1370_s22, [#allocation3], %s1251_s20, %s1251_s20, %s1252_s21  }
  0x45   :  { %s1255_s27 = smov [#allocation7]   ;;  %s1256_s30 = smov [#allocation10]  }
  0x46   :  { %s54_s29 = sshll.u32 %s1255_s27, 4  ;;  %s82_s14 = sshll.u32 %s1256_s30, 4  ;;  %s55_s29 = int_to_ptr.vmem [resolvable:$true] %s54_s29  ;;  %s1407_s14 = int_to_ptr.vmem [resolvable:$true] %s82_s14 }
  0x47   :  { %s1151_s15 = scalar_lea.hbm %s1545_s3, 1024 }
  0x48   :  { %p1152_p4 = scmp.ne.s32.totalorder %s1545_s3, %s1151_s15  ;;  %p1155_p5 = scmp.lt.u32.totalorder %s1151_s15, %s1545_s3 }
  0x4a   :  { %p1157_p6 = pnand %p1155_p5, %p1152_p4 }
  0x4c   :  { %1160 = shalt.err (!%p1157_p6)
}
  0x4d   :  { %s1161_s0 = scalar_lea.vmem %s55_s29, 1024  ;;  %p1166_p8 = scmp.lt.s32.totalorder %s55_s29, %s55_s29 }
  0x4e   :  { %p1162_p7 = scmp.ne.s32.totalorder %s55_s29, %s1161_s0  ;;  %p1167_p9 = scmp.lt.s32.totalorder %s1161_s0, %s1161_s0 }
  0x50   :  { %p1168_p10 = por %p1167_p9, %p1166_p8 }
  0x52   :  { %p1169_p11 = pnand %p1168_p10, %p1162_p7 }
  0x54   :  { %1172 = shalt.err (!%p1169_p11)
}
  0x55   :  { %60 = dma.hbm_to_vmem [thread:$0]  %s1545_s3, 1024, %s55_s29, [#allocation6], %s1251_s20, %s1251_s20, %s1252_s21  }
  0x56   :  { %s1173_s25 = scalar_lea.hbm %s1549_s7, 1024 }
  0x57   :  { %p1174_p12 = scmp.ne.s32.totalorder %s1549_s7, %s1173_s25  ;;  %p1177_p13 = scmp.lt.u32.totalorder %s1173_s25, %s1549_s7 }
  0x59   :  { %p1179_p0 = pnand %p1177_p13, %p1174_p12 }
  0x5b   :  { %1182 = shalt.err (!%p1179_p0)
}
  0x5c   :  { %s1183_s5 = scalar_lea.vmem %s1407_s14, 1024  ;;  %p1188_p2 = scmp.lt.s32.totalorder %s1407_s14, %s1407_s14 }
  0x5d   :  { %p1184_p1 = scmp.ne.s32.totalorder %s1407_s14, %s1183_s5  ;;  %p1189_p3 = scmp.lt.s32.totalorder %s1183_s5, %s1183_s5 }
  0x5f   :  { %p1190_p4 = por %p1189_p3, %p1188_p2 }
  0x61   :  { %p1191_p5 = pnand %p1190_p4, %p1184_p1 }
  0x63   :  { %1194 = shalt.err (!%p1191_p5)
}
  0x64   :  { %88 = dma.hbm_to_vmem [thread:$0]  %s1549_s7, 1024, %s1407_s14, [#allocation9], %s1251_s20, %s1251_s20, %s1252_s21  }
  0x65   :  { %s1257_s28 = smov [#allocation13]   ;;  %s1195_s26 = scalar_lea.hbm %s1553_s11, 1024 }
  0x66   :  { %s110_s15 = sshll.u32 %s1257_s28, 4  ;;  %p1196_p6 = scmp.ne.s32.totalorder %s1553_s11, %s1195_s26  ;;  %s111_s15 = int_to_ptr.vmem [resolvable:$true] %s110_s15 }
  0x67   :  { %p1199_p7 = scmp.lt.u32.totalorder %s1195_s26, %s1553_s11 }
  0x69   :  { %p1201_p8 = pnand %p1199_p7, %p1196_p6 }
  0x6b   :  { %1204 = shalt.err (!%p1201_p8)
}
  0x6c   :  { %s1205_s23 = scalar_lea.vmem %s111_s15, 1024  ;;  %p1210_p10 = scmp.lt.s32.totalorder %s111_s15, %s111_s15 }
  0x6d   :  { %p1206_p9 = scmp.ne.s32.totalorder %s111_s15, %s1205_s23  ;;  %p1211_p11 = scmp.lt.s32.totalorder %s1205_s23, %s1205_s23 }
  0x6f   :  { %p1212_p12 = por %p1211_p11, %p1210_p10 }
  0x71   :  { %p1213_p13 = pnand %p1212_p12, %p1206_p9 }
  0x73   :  { %1216 = shalt.err (!%p1213_p13)
}
  0x74   :  { %116 = dma.hbm_to_vmem [thread:$0]  %s1553_s11, 1024, %s111_s15, [#allocation12], %s1251_s20, %s1251_s20, %s1252_s21  }
  0x75   :  { %1239 = dma.done.wait [#allocation3], 128  }
  0x76   :  { %1240 = vsyncadd [#allocation3], 4294967168 }
  0x77   :  { %1241 = dma.done.wait [#allocation6], 1152  }
  0x78   :  { %1242 = vsyncadd [#allocation6], 4294966144 }
  0x79   :  { %1243 = dma.done.wait [#allocation9], 2048  }
  0x7a   :  { %1244 = vsyncadd [#allocation9], 4294965248 }
  0x7b   :  { %1245 = dma.done.wait [#allocation12], 2048  }
  0x7c   :  { %1246 = vsyncadd [#allocation12], 4294965248  ;;  %v1258_v0 = vmov 0.0   ;;  %vm1259_vm0 = vmmov 0   ;;  %v1021_v1 = vld [vmem:[#allocation5] sm:$0xff]   ;;  %v1022_v2 = vld [vmem:[#allocation2] sm:$0xff]  }
  0x7d   :  { %901 = vmatprep.subr.bf16.mxu0 %v1258_v0  ;;  %903 = vmatprep.mubr.msk.bf16.mxu0 %vm1259_vm0, %v1258_v0  ;;  %vm163_vm1 = vcmask 130048   ;;  %v1023_v3 = vld [vmem:[#allocation7] sm:$0xff]   ;;  %v1024_v4 = vld [vmem:[#allocation7 + $0x8] sm:$0xff]   ;;  %v1025_v5 = vld [vmem:[#allocation7 + $0x10] sm:$0xff]   ;;  %s1260_s30 = smov [#allocation14]  }
  0x7e   :  { %907 = vmatprep.subr.bf16.mxu1 %v1258_v0  ;;  %923 = vmatprep.mubr.msk.bf16.mxu1 %vm1259_vm0, %v1258_v0  ;;  %v1026_v6 = vld [vmem:[#allocation7 + $0x18] sm:$0xff]   ;;  %v1027_v7 = vld [vmem:[#allocation7 + $0x20] sm:$0xff]   ;;  %v1028_v8 = vld [vmem:[#allocation7 + $0x28] sm:$0xff]   ;;  %s790_s5 = sshll.u32 %s1260_s30, 4  ;;  %s791_s5 = int_to_ptr.vmem [resolvable:$true] %s790_s5 }
  0x7f   :  { %902 = vmatpush3.bf16.msra.mxu0 %v1021_v1  ;;  %908 = vmatpush3.bf16.msra.mxu1 %v1023_v3  ;;  %v1029_v9 = vld [vmem:[#allocation7 + $0x30] sm:$0xff]   ;;  %v1030_v10 = vld [vmem:[#allocation7 + $0x38] sm:$0xff]   ;;  %v1031_v11 = vld [vmem:[#allocation8] sm:$0xff]   ;;  %p1222_p1 = scmp.lt.s32.totalorder %s791_s5, %s791_s5 }
  0x80   :  { %927 = vmatprep.subr.bf16.mxu0 %v1258_v0  ;;  %909 = vmatprep.subr.bf16.mxu1 %v1258_v0  ;;  %v1032_v12 = vld [vmem:[#allocation8 + $0x8] sm:$0xff]   ;;  %v1033_v13 = vld [vmem:[#allocation8 + $0x10] sm:$0xff]   ;;  %v1034_v14 = vld [vmem:[#allocation8 + $0x18] sm:$0xff]  }
  0x81   :  { %v1035_v15 = vld [vmem:[#allocation8 + $0x20] sm:$0xff]   ;;  %v1036_v16 = vld [vmem:[#allocation8 + $0x28] sm:$0xff]   ;;  %v805_v17 = vld [vmem:[%s1544_s2] ss:$0 sm:$0xff] }
  0x82   :  { %904 = vmatmul.mubr.msk.bf16.vlgmr.msra.gmra.mrb[0].mxu0 %vm163_vm1, %v1022_v2  ;;  %v1037_v27 = vld [vmem:[#allocation8 + $0x30] sm:$0xff]   ;;  %v1038_v28 = vld [vmem:[#allocation8 + $0x38] sm:$0xff]   ;;  %v1039_v29 = vld [vmem:[#allocation10] sm:$0xff]  }
  0x83   :  { %943 = vmatprep.mubr.msk.bf16.mxu0 %vm1259_vm0, %v1258_v0  ;;  %910 = vmatpush3.bf16.msra.mxu1 %v1024_v4  ;;  %v1040_v30 = vld [vmem:[#allocation10 + $0x8] sm:$0xff]   ;;  %v1041_v31 = vld [vmem:[#allocation10 + $0x10] sm:$0xff]   ;;  %v1042_v32 = vld [vmem:[#allocation10 + $0x18] sm:$0xff]  }
  0x84   :  { %911 = vmatprep.subr.bf16.mxu1 %v1258_v0  ;;  %928 = vmatpush3.bf16.msra.mxu0 %v1031_v11  ;;  %v1043_v33 = vld [vmem:[#allocation10 + $0x20] sm:$0xff]   ;;  %v1044_v34 = vld [vmem:[#allocation10 + $0x28] sm:$0xff]   ;;  %v809_v35 = vld [vmem:[%s1546_s4] ss:$0 sm:$0xff] }
  0x85   :  { %929 = vmatprep.subr.bf16.mxu0 %v1258_v0  ;;  %v1045_v45 = vld [vmem:[#allocation10 + $0x30] sm:$0xff]   ;;  %v1046_v46 = vld [vmem:[#allocation10 + $0x38] sm:$0xff]   ;;  %v1047_v47 = vld [vmem:[#allocation11] sm:$0xff]  }
  0x86   :  { %v1048_v48 = vld [vmem:[#allocation11 + $0x8] sm:$0xff]   ;;  %v1049_v49 = vld [vmem:[#allocation11 + $0x10] sm:$0xff]   ;;  %v1050_v50 = vld [vmem:[#allocation11 + $0x18] sm:$0xff]  }
  0x87   :  { %912 = vmatpush3.bf16.msra.mxu1 %v1025_v5  ;;  %v1051_v51 = vld [vmem:[#allocation11 + $0x20] sm:$0xff]   ;;  %v1052_v52 = vld [vmem:[#allocation11 + $0x28] sm:$0xff]   ;;  %v818_v53 = vld [vmem:[%s1548_s6] ss:$0 sm:$0xff] }
  0x88   :  { %913 = vmatprep.subr.bf16.mxu1 %v1258_v0  ;;  %930 = vmatpush3.bf16.msra.mxu0 %v1032_v12  ;;  %v1053_v63 = vld [vmem:[#allocation11 + $0x30] sm:$0xff]   ;;  %v1054_v1 = vld [vmem:[#allocation11 + $0x38] sm:$0xff]   ;;  %v1055_v2 = vld [vmem:[#allocation13] sm:$0xff]  }
  0x89   :  { %931 = vmatprep.subr.bf16.mxu0 %v1258_v0  ;;  %v1056_v3 = vld [vmem:[#allocation13 + $0x8] sm:$0xff]   ;;  %v1057_v4 = vld [vmem:[#allocation13 + $0x10] sm:$0xff]   ;;  %v1058_v5 = vld [vmem:[#allocation13 + $0x18] sm:$0xff]  }
  0x8b   :  { %914 = vmatpush3.bf16.msra.mxu1 %v1026_v6  ;;  %v1059_v6 = vld [vmem:[#allocation13 + $0x20] sm:$0xff]  }
  0x8c   :  { %915 = vmatprep.subr.bf16.mxu1 %v1258_v0  ;;  %932 = vmatpush3.bf16.msra.mxu0 %v1033_v13 }
  0x8d   :  { %933 = vmatprep.subr.bf16.mxu0 %v1258_v0 }
  0x8f   :  { %916 = vmatpush3.bf16.msra.mxu1 %v1027_v7  ;;  %v1060_v7 = vld [vmem:[#allocation13 + $0x28] sm:$0xff]  }
  0x90   :  { %917 = vmatprep.subr.bf16.mxu1 %v1258_v0  ;;  %934 = vmatpush3.bf16.msra.mxu0 %v1034_v14 }
  0x91   :  { %935 = vmatprep.subr.bf16.mxu0 %v1258_v0 }
  0x93   :  { %918 = vmatpush3.bf16.msra.mxu1 %v1028_v8  ;;  %v827_v8 = vld [vmem:[%s1550_s8] ss:$0 sm:$0xff] }
  0x94   :  { %919 = vmatprep.subr.bf16.mxu1 %v1258_v0  ;;  %936 = vmatpush3.bf16.msra.mxu0 %v1035_v15 }
  0x95   :  { %937 = vmatprep.subr.bf16.mxu0 %v1258_v0 }
  0x97   :  { %920 = vmatpush3.bf16.msra.mxu1 %v1029_v9 }
  0x98   :  { %921 = vmatprep.subr.bf16.mxu1 %v1258_v0  ;;  %938 = vmatpush3.bf16.msra.mxu0 %v1036_v16 }
  0x99   :  { %939 = vmatprep.subr.bf16.mxu0 %v1258_v0 }
  0x9b   :  { %922 = vmatpush3.bf16.msra.mxu1 %v1030_v10 }
  0x9c   :  { %947 = vmatprep.subr.bf16.mxu1 %v1258_v0  ;;  %940 = vmatpush3.bf16.msra.mxu0 %v1037_v27 }
  0x9d   :  { %941 = vmatprep.subr.bf16.mxu0 %v1258_v0 }
  0xa0   :  { %942 = vmatpush3.bf16.msra.mxu0 %v1038_v28 }
  0xa1   :  { %967 = vmatprep.subr.bf16.mxu0 %v1258_v0 }
 0x155   :  { %v201_v18 = vpop.f32.mrb[0].mxu0 }
 0x156   :  { %v202_v19 = vadd.f32 %v805_v17, %v201_v18  ;;  %v905_v20 = vpop.f32.mrb[1].mxu0  ;;  %v1061_v18 = vld [vmem:[#allocation13 + $0x30] sm:$0xff]  }
 0x157   :  { %v204_v21 = vpop.f32.mrb[2].mxu0  ;;  %v836_v20 = vld [vmem:[%s1552_s10] ss:$0 sm:$0xff]  ;;  %s1217_s10 = scalar_lea.vmem %s791_s5, 256 }
 0x158   :  { %v205_v22 = vadd.f32 %v805_v17, %v204_v21  ;;  %v906_v23 = vpop.f32.mrb[3].mxu0  ;;  %v208_v24 = vmax.f32 %v202_v19, 0.0  ;;  %v1062_v19 = vld [vmem:[#allocation13 + $0x38] sm:$0xff]   ;;  %p1218_p0 = scmp.ne.s32.totalorder %s791_s5, %s1217_s10  ;;  %p1223_p2 = scmp.lt.s32.totalorder %s1217_s10, %s1217_s10 }
 0x15a   :  { %v209_v25 = vmax.f32 %v205_v22, 0.0  ;;  %p1224_p3 = por %p1223_p2, %p1222_p1 }
 0x15c   :  { %v210_v26 = vpack.c.bf16 %v209_v25, %v208_v24  ;;  %p1225_p4 = pnand %p1224_p3, %p1218_p0 }
 0x15e   :  { %924 = vmatmul.mubr.bf16.vlgmr.msra.gmra.mrb[0].mxu1 %v210_v26 }
 0x15f   :  { %963 = vmatprep.mubr.msk.bf16.mxu1 %vm1259_vm0, %v1258_v0  ;;  %948 = vmatpush3.bf16.msra.mxu1 %v1039_v29 }
 0x160   :  { %949 = vmatprep.subr.bf16.mxu1 %v1258_v0 }
 0x163   :  { %950 = vmatpush3.bf16.msra.mxu1 %v1040_v30 }
 0x164   :  { %951 = vmatprep.subr.bf16.mxu1 %v1258_v0 }
 0x167   :  { %952 = vmatpush3.bf16.msra.mxu1 %v1041_v31 }
 0x168   :  { %953 = vmatprep.subr.bf16.mxu1 %v1258_v0 }
 0x16b   :  { %954 = vmatpush3.bf16.msra.mxu1 %v1042_v32 }
 0x16c   :  { %955 = vmatprep.subr.bf16.mxu1 %v1258_v0 }
 0x16f   :  { %956 = vmatpush3.bf16.msra.mxu1 %v1043_v33 }
 0x170   :  { %957 = vmatprep.subr.bf16.mxu1 %v1258_v0 }
 0x173   :  { %958 = vmatpush3.bf16.msra.mxu1 %v1044_v34 }
 0x174   :  { %959 = vmatprep.subr.bf16.mxu1 %v1258_v0 }
 0x177   :  { %960 = vmatpush3.bf16.msra.mxu1 %v1045_v45 }
 0x178   :  { %961 = vmatprep.subr.bf16.mxu1 %v1258_v0 }
 0x17b   :  { %962 = vmatpush3.bf16.msra.mxu1 %v1046_v46 }
 0x17c   :  { %987 = vmatprep.subr.bf16.mxu1 %v1258_v0 }
 0x231   :  { %v316_v36 = vpop.f32.mrb[0].mxu1 }
 0x232   :  { %v317_v37 = vadd.f32 %v809_v35, %v316_v36  ;;  %v925_v38 = vpop.f32.mrb[1].mxu1 }
 0x233   :  { %v319_v39 = vpop.f32.mrb[2].mxu1 }
 0x234   :  { %v320_v40 = vadd.f32 %v809_v35, %v319_v39  ;;  %v926_v41 = vpop.f32.mrb[3].mxu1  ;;  %v323_v42 = vmax.f32 %v317_v37, 0.0 }
 0x236   :  { %v324_v43 = vmax.f32 %v320_v40, 0.0 }
 0x238   :  { %v325_v44 = vpack.c.bf16 %v324_v43, %v323_v42 }
 0x23a   :  { %944 = vmatmul.mubr.bf16.vlgmr.msra.gmra.mrb[4].mxu0 %v325_v44 }
 0x23b   :  { %983 = vmatprep.mubr.msk.bf16.mxu0 %vm1259_vm0, %v1258_v0  ;;  %968 = vmatpush3.bf16.msra.mxu0 %v1047_v47 }
 0x23c   :  { %969 = vmatprep.subr.bf16.mxu0 %v1258_v0 }
 0x23f   :  { %970 = vmatpush3.bf16.msra.mxu0 %v1048_v48 }
 0x240   :  { %971 = vmatprep.subr.bf16.mxu0 %v1258_v0 }
 0x243   :  { %972 = vmatpush3.bf16.msra.mxu0 %v1049_v49 }
 0x244   :  { %973 = vmatprep.subr.bf16.mxu0 %v1258_v0 }
 0x247   :  { %974 = vmatpush3.bf16.msra.mxu0 %v1050_v50 }
 0x248   :  { %975 = vmatprep.subr.bf16.mxu0 %v1258_v0 }
 0x24b   :  { %976 = vmatpush3.bf16.msra.mxu0 %v1051_v51 }
 0x24c   :  { %977 = vmatprep.subr.bf16.mxu0 %v1258_v0 }
 0x24f   :  { %978 = vmatpush3.bf16.msra.mxu0 %v1052_v52 }
 0x250   :  { %979 = vmatprep.subr.bf16.mxu0 %v1258_v0 }
 0x253   :  { %980 = vmatpush3.bf16.msra.mxu0 %v1053_v63 }
 0x254   :  { %981 = vmatprep.subr.bf16.mxu0 %v1258_v0 }
 0x257   :  { %982 = vmatpush3.bf16.msra.mxu0 %v1054_v1 }
 0x30d   :  { %v431_v54 = vpop.f32.mrb[4].mxu0 }
 0x30e   :  { %v432_v55 = vadd.f32 %v818_v53, %v431_v54  ;;  %v945_v56 = vpop.f32.mrb[5].mxu0 }
 0x30f   :  { %v434_v57 = vpop.f32.mrb[6].mxu0 }
 0x310   :  { %v435_v58 = vadd.f32 %v818_v53, %v434_v57  ;;  %v946_v59 = vpop.f32.mrb[7].mxu0  ;;  %v438_v60 = vmax.f32 %v432_v55, 0.0 }
 0x312   :  { %v439_v61 = vmax.f32 %v435_v58, 0.0 }
 0x314   :  { %v440_v62 = vpack.c.bf16 %v439_v61, %v438_v60 }
 0x316   :  { %964 = vmatmul.mubr.bf16.vlgmr.msra.gmra.mrb[4].mxu1 %v440_v62 }
 0x317   :  { %1003 = vmatprep.mubr.msk.bf16.mxu1 %vm1259_vm0, %v1258_v0  ;;  %988 = vmatpush3.bf16.msra.mxu1 %v1055_v2 }
 0x318   :  { %989 = vmatprep.subr.bf16.mxu1 %v1258_v0 }
 0x31b   :  { %990 = vmatpush3.bf16.msra.mxu1 %v1056_v3 }
 0x31c   :  { %991 = vmatprep.subr.bf16.mxu1 %v1258_v0 }
 0x31f   :  { %992 = vmatpush3.bf16.msra.mxu1 %v1057_v4 }
 0x320   :  { %993 = vmatprep.subr.bf16.mxu1 %v1258_v0 }
 0x323   :  { %994 = vmatpush3.bf16.msra.mxu1 %v1058_v5 }
 0x324   :  { %995 = vmatprep.subr.bf16.mxu1 %v1258_v0 }
 0x327   :  { %996 = vmatpush3.bf16.msra.mxu1 %v1059_v6 }
 0x328   :  { %997 = vmatprep.subr.bf16.mxu1 %v1258_v0 }
 0x32b   :  { %998 = vmatpush3.bf16.msra.mxu1 %v1060_v7 }
 0x32c   :  { %999 = vmatprep.subr.bf16.mxu1 %v1258_v0 }
 0x32f   :  { %1000 = vmatpush3.bf16.msra.mxu1 %v1061_v18 }
 0x330   :  { %1001 = vmatprep.subr.bf16.mxu1 %v1258_v0  ;;  %v845_v0 = vld [vmem:[%s1554_s12] ss:$0 sm:$0xff] }
 0x333   :  { %1002 = vmatpush3.bf16.msra.mxu1 %v1062_v19 }
 0x3e9   :  { %v546_v9 = vpop.f32.mrb[4].mxu1 }
 0x3ea   :  { %v547_v10 = vadd.f32 %v827_v8, %v546_v9  ;;  %v965_v11 = vpop.f32.mrb[5].mxu1 }
 0x3eb   :  { %v549_v12 = vpop.f32.mrb[6].mxu1 }
 0x3ec   :  { %v550_v13 = vadd.f32 %v827_v8, %v549_v12  ;;  %v966_v14 = vpop.f32.mrb[7].mxu1  ;;  %v553_v15 = vmax.f32 %v547_v10, 0.0 }
 0x3ee   :  { %v554_v16 = vmax.f32 %v550_v13, 0.0 }
 0x3f0   :  { %v555_v17 = vpack.c.bf16 %v554_v16, %v553_v15 }
 0x3f2   :  { %984 = vmatmul.mubr.bf16.vlgmr.msra.gmra.mrb[8].mxu0 %v555_v17 }
 0x4c5   :  { %v661_v21 = vpop.f32.mrb[8].mxu0 }
 0x4c6   :  { %v662_v22 = vadd.f32 %v836_v20, %v661_v21  ;;  %v985_v23 = vpop.f32.mrb[9].mxu0 }
 0x4c7   :  { %v664_v24 = vpop.f32.mrb[10].mxu0 }
 0x4c8   :  { %v665_v25 = vadd.f32 %v836_v20, %v664_v24  ;;  %v986_v26 = vpop.f32.mrb[11].mxu0  ;;  %v668_v27 = vmax.f32 %v662_v22, 0.0 }
 0x4ca   :  { %v669_v28 = vmax.f32 %v665_v25, 0.0 }
 0x4cc   :  { %v670_v29 = vpack.c.bf16 %v669_v28, %v668_v27 }
 0x4ce   :  { %1004 = vmatmul.mubr.bf16.vlgmr.msra.gmra.mrb[8].mxu1 %v670_v29 }
 0x5a1   :  { %v776_v30 = vpop.f32.mrb[8].mxu1 }
 0x5a2   :  { %v777_v31 = vadd.f32 %v845_v0, %v776_v30  ;;  %v1005_v32 = vpop.f32.mrb[9].mxu1 }
 0x5a3   :  { %v779_v33 = vpop.f32.mrb[10].mxu1 }
 0x5a4   :  { %783 = vst [vmem:[#allocation14] sm:$0xff] %v777_v31  ;;  %v780_v34 = vadd.f32 %v845_v0, %v779_v33  ;;  %v1006_v35 = vpop.f32.mrb[11].mxu1 }
 0x5a6   :  { %784 = vst [vmem:[#allocation14 + $0x8] sm:$0xff] %v780_v34 }
 0x5a7   :  { %1228 = shalt.err (!%p1225_p4)
}
 0x5a8   :  { %s1229_s29 = scalar_lea.hbm %s1555_s13, 256 }
 0x5a9   :  { %p1230_p5 = scmp.ne.s32.totalorder %s1555_s13, %s1229_s29  ;;  %p1233_p6 = scmp.lt.u32.totalorder %s1229_s29, %s1555_s13 }
 0x5ab   :  { %p1235_p7 = pnand %p1233_p6, %p1230_p5 }
 0x5ad   :  { %1238 = shalt.err (!%p1235_p7)
}
 0x5ae   :  { %s1261_s26 = smov 128   ;;  %s1262_s17 = smov 8  }
 0x5af   :  { %796 = dma.vmem_to_hbm [thread:$0]  %s791_s5, 256, %s1555_s13, [#allocation4], %s1261_s26, %s1261_s26, %s1262_s17  }
 0x5b0   :  { %1247 = dma.done.wait [#allocation4], 256  }
 0x5b1   :  { %1248 = vsyncadd [#allocation4], 4294967040 }
 0x5b2   :  { %800 = vsyncpa [#allocation3], 1 }
 0x5b3   :  { %801 = vsyncpa [#allocation6], 1 }
 0x5b4   :  { %802 = vsyncpa [#allocation9], 1 }
 0x5b5   :  { %803 = vsyncpa [#allocation12], 1 }
 0x5b6   :  { %804 = vsyncpa [#allocation4], 1 }

</bundles_post_ra>
